<compile_context>
chip_gen: v7x
topology: tpu7x:2x2x1
jax: 0.10.0
libtpu: 0.0.40
codegen_flags: <defaults>
</compile_context>

<pallas_src>
import functools

import jax
import jax.numpy as jnp
from jax import lax
from jax.experimental import pallas as pl
from jax.experimental.pallas import tpu as pltpu


# ------------------------------- fused kernel -------------------------------- #

def _disc_fused_kernel(patches_ref, w1_ref, w2_ref, w3_ref, w4_ref, wadv_ref,
                       pvec_ref, o_ref, a1_scr, a2_scr, a3_scr, *, alpha):
    """Entire Discriminator_4Ca forward for ONE image; activations stay in VMEM."""
    pv = pvec_ref[...]                      # packed per-channel params, one (16,128) tile

    def chan_params(layer, c):
        r = 3 * layer
        return pv[r:r + 1, :c], pv[r + 1:r + 2, :c], pv[r + 2:r + 3, :c]

    def conv_bn(patches, w, layer, c_out):
        bias, scale, shift = chan_params(layer, c_out)
        z = jnp.dot(patches, w, preferred_element_type=jnp.float32) + bias
        a = jnp.where(z > 0, z, alpha * z)                 # LeakyReLU(0.2)
        # TODO(synk): Dropout2d(0.25) is identity at inference; training-mode channel
        # masks + rescale are not implemented here.
        return a * scale + shift                           # BatchNorm affine (1/0 for layer 0)

    def im2col(scr, ho, wo, c_in):
        # scr: zero-bordered [H+2, W+2, c_in]; tap (kh,kw) of a 3x3/stride-2/pad-1 conv
        # is a strided slice starting at (kh, kw).  One lane-concat -> K = 9*c_in.
        taps = [scr[pl.ds(kh, ho, stride=2), pl.ds(kw, wo, stride=2), :]
                for kh in range(3) for kw in range(3)]
        return jnp.concatenate(taps, axis=-1).reshape(ho * wo, 9 * c_in)

    def store_padded(scr, a, h, w, c):
        scr[...] = jnp.zeros_like(scr)                     # (re)zero borders every step
        scr[1:1 + h, 1:1 + w, :] = a.reshape(h, w, c)

    # ---- layer 1: Conv(1->16), no BN.  Per-image patch matrix [256, 9] from wrapper. ----
    a1 = conv_bn(patches_ref[0], w1_ref[...], 0, 16)              # [256, 16]
    store_padded(a1_scr, a1, 16, 16, 16)

    # ---- layers 2-4: strided-tap im2col + one K=9*Cin matmul each ----
    a2 = conv_bn(im2col(a1_scr, 8, 8, 16), w2_ref[...], 1, 32)    # [64, 32]
    store_padded(a2_scr, a2, 8, 8, 32)

    a3 = conv_bn(im2col(a2_scr, 4, 4, 32), w3_ref[...], 2, 64)    # [16, 64]
    store_padded(a3_scr, a3, 4, 4, 64)

    a4 = conv_bn(im2col(a3_scr, 2, 2, 64), w4_ref[...], 3, 128)   # [4, 128]

    # ---- adv layer: Linear(512->1) + Sigmoid, (C,H,W) flatten folded into wadv ----
    prod = a4 * wadv_ref[...]                                     # [4, 128]
    s = jnp.sum(prod, axis=1, keepdims=True)                      # [4, 1]   lane reduce
    logit = jnp.sum(s, axis=0, keepdims=True) + pv[12:13, 0:1]    # [1, 1]
    val = 1.0 / (1.0 + jnp.exp(-logit))                           # Sigmoid
    o_ref[0] = jnp.broadcast_to(val, (1, 128))                    # lane-dense store


# ------------------------------ wrapper / prep -------------------------------- #

@jax.jit
def discriminator_4ca(img, prepped):
    """Forward pass.  img: [B, 1, 32, 32] float32 -> validity [B, 1]."""
    w1, w2, w3, w4, wadv, pvec = prepped
    B, _, H, W = img.shape
    Ho, Wo = H // 2, W // 2

    # Layer-1 im2col on the raw input only (cheap XLA glue; everything after stays
    # inside the single pallas_call).
    xp = jnp.pad(img[:, 0], ((0, 0), (1, 1), (1, 1)))             # [B, H+2, W+2]
    taps = [xp[:, kh:kh + H:2, kw:kw + W:2] for kh in range(3) for kw in range(3)]
    patches = jnp.stack(taps, axis=-1).reshape(B, Ho * Wo, 9)     # rows in (h, w) order

    kernel = functools.partial(_disc_fused_kernel, alpha=0.2)

    flops = 2 * B * (Ho * Wo * 9 * 16 + 64 * 144 * 32 + 16 * 288 * 64 + 4 * 576 * 128)
    bytes_accessed = 4 * ((9 * 16 + 144 * 32 + 288 * 64 + 576 * 128 + 4 * 128 + 16 * 128)
                          + B * (Ho * Wo * 9 + 128))

    out = pl.pallas_call(
        kernel,
        out_shape=jax.ShapeDtypeStruct((B, 1, 128), jnp.float32),
        grid_spec=pltpu.PrefetchScalarGridSpec(
            num_scalar_prefetch=0,
            grid=(B,),
            in_specs=[
                pl.BlockSpec((1, Ho * Wo, 9), lambda b: (b, 0, 0)),   # per-image patches
                pl.BlockSpec((9, 16), lambda b: (0, 0)),              # w1
                pl.BlockSpec((144, 32), lambda b: (0, 0)),            # w2  (K = 9*16)
                pl.BlockSpec((288, 64), lambda b: (0, 0)),            # w3  (K = 9*32)
                pl.BlockSpec((576, 128), lambda b: (0, 0)),           # w4  (K = 9*64)
                pl.BlockSpec((4, 128), lambda b: (0, 0)),             # adv weight
                pl.BlockSpec((16, 128), lambda b: (0, 0)),            # packed params
            ],
            out_specs=pl.BlockSpec((1, 1, 128), lambda b: (b, 0, 0)),
            scratch_shapes=[
                pltpu.VMEM((18, 18, 16), jnp.float32),   # layer-1 activation, zero border
                pltpu.VMEM((10, 10, 32), jnp.float32),   # layer-2 activation
                pltpu.VMEM((6, 6, 64), jnp.float32),     # layer-3 activation
            ],
        ),
        compiler_params=pltpu.CompilerParams(dimension_semantics=("parallel",)),
        cost_estimate=pl.CostEstimate(flops=int(flops), transcendentals=int(B),
                                      bytes_accessed=int(bytes_accessed)),
    )(patches, w1, w2, w3, w4, wadv, pvec)
    return out[:, 0, :1]                                          # [B, 1]


def prepare_params(conv_params, lin_params):
    """Rearrange conv weights to [9*Cin, Cout] (K ordered kh,kw,cin to match the
    in-kernel tap concat), pack bias/BN-scale/BN-shift + adv bias into one (16,128)
    tile, and fold the PyTorch (C,H,W) flatten order into the adv-layer weight.
    Batch-independent (per-image blocks in the kernel)."""
    ws = []
    pvec = jnp.zeros((16, 128), jnp.float32)
    for l, (w, b, scale, shift) in enumerate(conv_params):
        cout, cin = w.shape[0], w.shape[1]
        ws.append(jnp.transpose(w, (2, 3, 1, 0)).reshape(9 * cin, cout))
        pvec = pvec.at[3 * l, :cout].set(b)
        pvec = pvec.at[3 * l + 1, :cout].set(scale)      # BN applied post-activation
        pvec = pvec.at[3 * l + 2, :cout].set(shift)      # (no sign assumption on gamma)
    lw, lb = lin_params
    pvec = pvec.at[12, 0].set(lb[0])
    # adv weight [1, 512] indexed by c*4 + h*2 + w  ->  [4, 128] tile indexed (h*2+w, c)
    wadv = lw.reshape(128, 4).T
    return (ws[0], ws[1], ws[2], ws[3], wadv, pvec)


# ------------------------------ reference & params ----------------------------- #

def _reference_forward(img, conv_params, lin_params):
    """Pure-JAX/XLA reference of the PyTorch module (f32, HIGHEST precision)."""
    out = img
    for w, b, scale, shift in conv_params:
        out = lax.conv_general_dilated(out, w, window_strides=(2, 2),
                                       padding=((1, 1), (1, 1)),
                                       dimension_numbers=("NCHW", "OIHW", "NCHW"),
                                       precision=lax.Precision.HIGHEST)
        out = out + b[None, :, None, None]
        out = jnp.where(out > 0, out, 0.2 * out)          # LeakyReLU(0.2)
        out = out * scale[None, :, None, None] + shift[None, :, None, None]
    flat = out.reshape(out.shape[0], -1)                  # PyTorch (C,H,W) order
    lw, lb = lin_params
    return jax.nn.sigmoid(flat @ lw.T + lb)


def init_params(key):
    """Conv2d(1->16,no BN), Conv2d(16->32), Conv2d(32->64), Conv2d(64->128), Linear(512->1)."""
    specs = [(16, 1, False), (32, 16, True), (64, 32, True), (128, 64, True)]
    conv_params = []
    eps = 0.8                                             # BatchNorm2d(out, 0.8) -> eps=0.8
    for cout, cin, has_bn in specs:
        key, kw, kb, kg, kbe, km, kv = jax.random.split(key, 7)
        bound = 1.0 / jnp.sqrt(cin * 9.0)
        w = jax.random.uniform(kw, (cout, cin, 3, 3), jnp.float32, -bound, bound)
        b = jax.random.uniform(kb, (cout,), jnp.float32, -bound, bound)
        if has_bn:
            gamma = jax.random.uniform(kg, (cout,), jnp.float32, 0.5, 1.5)
            beta = 0.1 * jax.random.normal(kbe, (cout,), jnp.float32)
            mean = 0.1 * jax.random.normal(km, (cout,), jnp.float32)
            var = jax.random.uniform(kv, (cout,), jnp.float32, 0.5, 1.5)
            scale = gamma / jnp.sqrt(var + eps)
            shift = beta - mean * scale
        else:
            scale = jnp.ones((cout,), jnp.float32)
            shift = jnp.zeros((cout,), jnp.float32)
        conv_params.append((w, b, scale, shift))

    key, kw, kb = jax.random.split(key, 3)
    lin_in = 128 * 2 * 2
    bound = 1.0 / jnp.sqrt(float(lin_in))
    lw = jax.random.uniform(kw, (1, lin_in), jnp.float32, -bound, bound)
    lb = jax.random.uniform(kb, (1,), jnp.float32, -bound, bound)
    return conv_params, (lw, lb)


# ----------------------------------- main ----------------------------------- #

if __name__ == "__main__":
    key = jax.random.PRNGKey(0)
    kparams, kimg = jax.random.split(key)
    conv_params, lin_params = init_params(kparams)

    # ds_size = 2 in the module implies 32x32 single-channel input
    # (32 -> 16 -> 8 -> 4 -> 2 through four stride-2 convs).
    img = jax.random.normal(kimg, (2, 1, 32, 32), jnp.float32)

    prepped = prepare_params(conv_params, lin_params)
    validity = discriminator_4ca(img, prepped)
    jax.block_until_ready(validity)

    assert validity.shape == (2, 1)
    assert bool(jnp.all((validity >= 0.0) & (validity <= 1.0)))

    # Cross-check the fused kernel against a plain-XLA f32 reference.
    ref = _reference_forward(img, conv_params, lin_params)
    assert bool(jnp.all(jnp.abs(validity - ref) < 2e-3)), "mismatch vs reference"

    print("KERNEL_OK")
</pallas_src>

<mosaic_0001>
module attributes {stable_mosaic.version = 11 : i64} {
  func.func @_disc_fused_kernel(%arg0: i32, %arg1: memref<1x256x9xf32, #tpu.memory_space<vmem>>, %arg2: memref<9x16xf32, #tpu.memory_space<vmem>>, %arg3: memref<144x32xf32, #tpu.memory_space<vmem>>, %arg4: memref<288x64xf32, #tpu.memory_space<vmem>>, %arg5: memref<576x128xf32, #tpu.memory_space<vmem>>, %arg6: memref<4x128xf32, #tpu.memory_space<vmem>>, %arg7: memref<16x128xf32, #tpu.memory_space<vmem>>, %arg8: memref<1x1x128xf32, #tpu.memory_space<vmem>>, %arg9: memref<18x18x16xf32, #tpu.memory_space<vmem>>, %arg10: memref<10x10x32xf32, #tpu.memory_space<vmem>>, %arg11: memref<6x6x64xf32, #tpu.memory_space<vmem>>) attributes {dimension_semantics = [#tpu.dimension_semantics<parallel>], iteration_bounds = array<i64: 2>, scalar_prefetch = 0 : i64, scratch_operands = 3 : i64, tpu.core_type = #tpu.core_type<tc>, window_params = [{transform_indices = @transform_0, window_bounds = array<i64: 1, 256, 9>}, {pipeline_mode = #tpu.pipeline_mode<synchronous>, transform_indices = @transform_1, window_bounds = array<i64: 9, 16>}, {pipeline_mode = #tpu.pipeline_mode<synchronous>, transform_indices = @transform_2, window_bounds = array<i64: 144, 32>}, {pipeline_mode = #tpu.pipeline_mode<synchronous>, transform_indices = @transform_3, window_bounds = array<i64: 288, 64>}, {pipeline_mode = #tpu.pipeline_mode<synchronous>, transform_indices = @transform_4, window_bounds = array<i64: 576, 128>}, {pipeline_mode = #tpu.pipeline_mode<synchronous>, transform_indices = @transform_5, window_bounds = array<i64: 4, 128>}, {pipeline_mode = #tpu.pipeline_mode<synchronous>, transform_indices = @transform_6, window_bounds = array<i64: 16, 128>}, {transform_indices = @transform_7, window_bounds = array<i64: 1, 1, 128>}]} {
    %c0 = arith.constant 0 : index
    %c0_0 = arith.constant 0 : index
    %0 = vector.load %arg7[%c0, %c0_0] : memref<16x128xf32, #tpu.memory_space<vmem>>, vector<16x128xf32>
    %c0_1 = arith.constant 0 : index
    %c0_2 = arith.constant 0 : index
    %c0_3 = arith.constant 0 : index
    %1 = vector.load %arg1[%c0_1, %c0_2, %c0_3] : memref<1x256x9xf32, #tpu.memory_space<vmem>>, vector<1x256x9xf32>
    %2 = vector.shape_cast %1 : vector<1x256x9xf32> to vector<256x9xf32>
    %c0_4 = arith.constant 0 : index
    %c0_5 = arith.constant 0 : index
    %3 = vector.load %arg2[%c0_4, %c0_5] : memref<9x16xf32, #tpu.memory_space<vmem>>, vector<9x16xf32>
    %4 = vector.extract_strided_slice %0 {offsets = [0, 0], sizes = [1, 16], strides = [1, 1]} : vector<16x128xf32> to vector<1x16xf32>
    %5 = vector.extract_strided_slice %0 {offsets = [1, 0], sizes = [1, 16], strides = [1, 1]} : vector<16x128xf32> to vector<1x16xf32>
    %6 = vector.extract_strided_slice %0 {offsets = [2, 0], sizes = [1, 16], strides = [1, 1]} : vector<16x128xf32> to vector<1x16xf32>
    %cst = arith.constant dense<0.000000e+00> : vector<256x16xf32>
    %7 = tpu.matmul %2, %3, %cst {dimension_numbers = #tpu.dot_dimension_numbers<[1], [0], [0], [1], [0, 0, 1, 1], [], []>} : vector<256x9xf32>, vector<9x16xf32>, vector<256x16xf32> -> vector<256x16xf32>
    %8 = vector.broadcast %4 : vector<1x16xf32> to vector<256x16xf32>
    %9 = arith.addf %7, %8 : vector<256x16xf32>
    %cst_6 = arith.constant 0.000000e+00 : f32
    %10 = vector.broadcast %cst_6 : f32 to vector<256x16xf32>
    %11 = arith.cmpf ogt, %9, %10 : vector<256x16xf32>
    %cst_7 = arith.constant 2.000000e-01 : f32
    %12 = vector.broadcast %cst_7 : f32 to vector<256x16xf32>
    %13 = arith.mulf %12, %9 : vector<256x16xf32>
    %14 = arith.select %11, %9, %13 : vector<256x16xi1>, vector<256x16xf32>
    %15 = vector.broadcast %5 : vector<1x16xf32> to vector<256x16xf32>
    %16 = arith.mulf %14, %15 : vector<256x16xf32>
    %17 = vector.broadcast %6 : vector<1x16xf32> to vector<256x16xf32>
    %18 = arith.addf %16, %17 : vector<256x16xf32>
    %cst_8 = arith.constant 0.000000e+00 : f32
    %19 = vector.broadcast %cst_8 : f32 to vector<18x18x16xf32>
    %c0_9 = arith.constant 0 : index
    %c0_10 = arith.constant 0 : index
    %c0_11 = arith.constant 0 : index
    %20 = vector.load %arg9[%c0_9, %c0_10, %c0_11] : memref<18x18x16xf32, #tpu.memory_space<vmem>>, vector<18x18x16xf32>
    tpu.vector_store %arg9[%c0_9, %c0_10, %c0_11], %19 {strides = array<i32>} : memref<18x18x16xf32, #tpu.memory_space<vmem>>, vector<18x18x16xf32>,
    %21 = vector.shape_cast %18 : vector<256x16xf32> to vector<16x16x16xf32>
    %c1 = arith.constant 1 : index
    %c1_12 = arith.constant 1 : index
    %c0_13 = arith.constant 0 : index
    %22 = vector.load %arg9[%c1, %c1_12, %c0_13] : memref<18x18x16xf32, #tpu.memory_space<vmem>>, vector<16x16x16xf32>
    tpu.vector_store %arg9[%c1, %c1_12, %c0_13], %21 {strides = array<i32>} : memref<18x18x16xf32, #tpu.memory_space<vmem>>, vector<16x16x16xf32>,
    %c0_14 = arith.constant 0 : index
    %c0_15 = arith.constant 0 : index
    %c0_16 = arith.constant 0 : index
    %23 = tpu.strided_load %arg9[%c0_14, %c0_15, %c0_16] {strides = array<i32: 2, 2, 1>} : memref<18x18x16xf32, #tpu.memory_space<vmem>>, vector<8x8x16xf32>
    %c0_17 = arith.constant 0 : index
    %c1_18 = arith.constant 1 : index
    %c0_19 = arith.constant 0 : index
    %24 = tpu.strided_load %arg9[%c0_17, %c1_18, %c0_19] {strides = array<i32: 2, 2, 1>} : memref<18x18x16xf32, #tpu.memory_space<vmem>>, vector<8x8x16xf32>
    %c0_20 = arith.constant 0 : index
    %c2 = arith.constant 2 : index
    %c0_21 = arith.constant 0 : index
    %25 = tpu.strided_load %arg9[%c0_20, %c2, %c0_21] {strides = array<i32: 2, 2, 1>} : memref<18x18x16xf32, #tpu.memory_space<vmem>>, vector<8x8x16xf32>
    %c1_22 = arith.constant 1 : index
    %c0_23 = arith.constant 0 : index
    %c0_24 = arith.constant 0 : index
    %26 = tpu.strided_load %arg9[%c1_22, %c0_23, %c0_24] {strides = array<i32: 2, 2, 1>} : memref<18x18x16xf32, #tpu.memory_space<vmem>>, vector<8x8x16xf32>
    %c1_25 = arith.constant 1 : index
    %c1_26 = arith.constant 1 : index
    %c0_27 = arith.constant 0 : index
    %27 = tpu.strided_load %arg9[%c1_25, %c1_26, %c0_27] {strides = array<i32: 2, 2, 1>} : memref<18x18x16xf32, #tpu.memory_space<vmem>>, vector<8x8x16xf32>
    %c1_28 = arith.constant 1 : index
    %c2_29 = arith.constant 2 : index
    %c0_30 = arith.constant 0 : index
    %28 = tpu.strided_load %arg9[%c1_28, %c2_29, %c0_30] {strides = array<i32: 2, 2, 1>} : memref<18x18x16xf32, #tpu.memory_space<vmem>>, vector<8x8x16xf32>
    %c2_31 = arith.constant 2 : index
    %c0_32 = arith.constant 0 : index
    %c0_33 = arith.constant 0 : index
    %29 = tpu.strided_load %arg9[%c2_31, %c0_32, %c0_33] {strides = array<i32: 2, 2, 1>} : memref<18x18x16xf32, #tpu.memory_space<vmem>>, vector<8x8x16xf32>
    %c2_34 = arith.constant 2 : index
    %c1_35 = arith.constant 1 : index
    %c0_36 = arith.constant 0 : index
    %30 = tpu.strided_load %arg9[%c2_34, %c1_35, %c0_36] {strides = array<i32: 2, 2, 1>} : memref<18x18x16xf32, #tpu.memory_space<vmem>>, vector<8x8x16xf32>
    %c2_37 = arith.constant 2 : index
    %c2_38 = arith.constant 2 : index
    %c0_39 = arith.constant 0 : index
    %31 = tpu.strided_load %arg9[%c2_37, %c2_38, %c0_39] {strides = array<i32: 2, 2, 1>} : memref<18x18x16xf32, #tpu.memory_space<vmem>>, vector<8x8x16xf32>
    %32 = tpu.concatenate %23, %24, %25, %26, %27, %28, %29, %30, %31 in 2 : vector<8x8x16xf32>, vector<8x8x16xf32>, vector<8x8x16xf32>, vector<8x8x16xf32>, vector<8x8x16xf32>, vector<8x8x16xf32>, vector<8x8x16xf32>, vector<8x8x16xf32>, vector<8x8x16xf32> -> vector<8x8x144xf32>
    %33 = vector.shape_cast %32 : vector<8x8x144xf32> to vector<64x144xf32>
    %c0_40 = arith.constant 0 : index
    %c0_41 = arith.constant 0 : index
    %34 = vector.load %arg3[%c0_40, %c0_41] : memref<144x32xf32, #tpu.memory_space<vmem>>, vector<144x32xf32>
    %35 = vector.extract_strided_slice %0 {offsets = [3, 0], sizes = [1, 32], strides = [1, 1]} : vector<16x128xf32> to vector<1x32xf32>
    %36 = vector.extract_strided_slice %0 {offsets = [4, 0], sizes = [1, 32], strides = [1, 1]} : vector<16x128xf32> to vector<1x32xf32>
    %37 = vector.extract_strided_slice %0 {offsets = [5, 0], sizes = [1, 32], strides = [1, 1]} : vector<16x128xf32> to vector<1x32xf32>
    %cst_42 = arith.constant dense<0.000000e+00> : vector<64x32xf32>
    %38 = tpu.matmul %33, %34, %cst_42 {dimension_numbers = #tpu.dot_dimension_numbers<[1], [0], [0], [1], [0, 0, 1, 1], [], []>} : vector<64x144xf32>, vector<144x32xf32>, vector<64x32xf32> -> vector<64x32xf32>
    %39 = vector.broadcast %35 : vector<1x32xf32> to vector<64x32xf32>
    %40 = arith.addf %38, %39 : vector<64x32xf32>
    %cst_43 = arith.constant 0.000000e+00 : f32
    %41 = vector.broadcast %cst_43 : f32 to vector<64x32xf32>
    %42 = arith.cmpf ogt, %40, %41 : vector<64x32xf32>
    %cst_44 = arith.constant 2.000000e-01 : f32
    %43 = vector.broadcast %cst_44 : f32 to vector<64x32xf32>
    %44 = arith.mulf %43, %40 : vector<64x32xf32>
    %45 = arith.select %42, %40, %44 : vector<64x32xi1>, vector<64x32xf32>
    %46 = vector.broadcast %36 : vector<1x32xf32> to vector<64x32xf32>
    %47 = arith.mulf %45, %46 : vector<64x32xf32>
    %48 = vector.broadcast %37 : vector<1x32xf32> to vector<64x32xf32>
    %49 = arith.addf %47, %48 : vector<64x32xf32>
    %cst_45 = arith.constant 0.000000e+00 : f32
    %50 = vector.broadcast %cst_45 : f32 to vector<10x10x32xf32>
    %c0_46 = arith.constant 0 : index
    %c0_47 = arith.constant 0 : index
    %c0_48 = arith.constant 0 : index
    %51 = vector.load %arg10[%c0_46, %c0_47, %c0_48] : memref<10x10x32xf32, #tpu.memory_space<vmem>>, vector<10x10x32xf32>
    tpu.vector_store %arg10[%c0_46, %c0_47, %c0_48], %50 {strides = array<i32>} : memref<10x10x32xf32, #tpu.memory_space<vmem>>, vector<10x10x32xf32>,
    %52 = vector.shape_cast %49 : vector<64x32xf32> to vector<8x8x32xf32>
    %c1_49 = arith.constant 1 : index
    %c1_50 = arith.constant 1 : index
    %c0_51 = arith.constant 0 : index
    %53 = vector.load %arg10[%c1_49, %c1_50, %c0_51] : memref<10x10x32xf32, #tpu.memory_space<vmem>>, vector<8x8x32xf32>
    tpu.vector_store %arg10[%c1_49, %c1_50, %c0_51], %52 {strides = array<i32>} : memref<10x10x32xf32, #tpu.memory_space<vmem>>, vector<8x8x32xf32>,
    %c0_52 = arith.constant 0 : index
    %c0_53 = arith.constant 0 : index
    %c0_54 = arith.constant 0 : index
    %54 = tpu.strided_load %arg10[%c0_52, %c0_53, %c0_54] {strides = array<i32: 2, 2, 1>} : memref<10x10x32xf32, #tpu.memory_space<vmem>>, vector<4x4x32xf32>
    %c0_55 = arith.constant 0 : index
    %c1_56 = arith.constant 1 : index
    %c0_57 = arith.constant 0 : index
    %55 = tpu.strided_load %arg10[%c0_55, %c1_56, %c0_57] {strides = array<i32: 2, 2, 1>} : memref<10x10x32xf32, #tpu.memory_space<vmem>>, vector<4x4x32xf32>
    %c0_58 = arith.constant 0 : index
    %c2_59 = arith.constant 2 : index
    %c0_60 = arith.constant 0 : index
    %56 = tpu.strided_load %arg10[%c0_58, %c2_59, %c0_60] {strides = array<i32: 2, 2, 1>} : memref<10x10x32xf32, #tpu.memory_space<vmem>>, vector<4x4x32xf32>
    %c1_61 = arith.constant 1 : index
    %c0_62 = arith.constant 0 : index
    %c0_63 = arith.constant 0 : index
    %57 = tpu.strided_load %arg10[%c1_61, %c0_62, %c0_63] {strides = array<i32: 2, 2, 1>} : memref<10x10x32xf32, #tpu.memory_space<vmem>>, vector<4x4x32xf32>
    %c1_64 = arith.constant 1 : index
    %c1_65 = arith.constant 1 : index
    %c0_66 = arith.constant 0 : index
    %58 = tpu.strided_load %arg10[%c1_64, %c1_65, %c0_66] {strides = array<i32: 2, 2, 1>} : memref<10x10x32xf32, #tpu.memory_space<vmem>>, vector<4x4x32xf32>
    %c1_67 = arith.constant 1 : index
    %c2_68 = arith.constant 2 : index
    %c0_69 = arith.constant 0 : index
    %59 = tpu.strided_load %arg10[%c1_67, %c2_68, %c0_69] {strides = array<i32: 2, 2, 1>} : memref<10x10x32xf32, #tpu.memory_space<vmem>>, vector<4x4x32xf32>
    %c2_70 = arith.constant 2 : index
    %c0_71 = arith.constant 0 : index
    %c0_72 = arith.constant 0 : index
    %60 = tpu.strided_load %arg10[%c2_70, %c0_71, %c0_72] {strides = array<i32: 2, 2, 1>} : memref<10x10x32xf32, #tpu.memory_space<vmem>>, vector<4x4x32xf32>
    %c2_73 = arith.constant 2 : index
    %c1_74 = arith.constant 1 : index
    %c0_75 = arith.constant 0 : index
    %61 = tpu.strided_load %arg10[%c2_73, %c1_74, %c0_75] {strides = array<i32: 2, 2, 1>} : memref<10x10x32xf32, #tpu.memory_space<vmem>>, vector<4x4x32xf32>
    %c2_76 = arith.constant 2 : index
    %c2_77 = arith.constant 2 : index
    %c0_78 = arith.constant 0 : index
    %62 = tpu.strided_load %arg10[%c2_76, %c2_77, %c0_78] {strides = array<i32: 2, 2, 1>} : memref<10x10x32xf32, #tpu.memory_space<vmem>>, vector<4x4x32xf32>
    %63 = tpu.concatenate %54, %55, %56, %57, %58, %59, %60, %61, %62 in 2 : vector<4x4x32xf32>, vector<4x4x32xf32>, vector<4x4x32xf32>, vector<4x4x32xf32>, vector<4x4x32xf32>, vector<4x4x32xf32>, vector<4x4x32xf32>, vector<4x4x32xf32>, vector<4x4x32xf32> -> vector<4x4x288xf32>
    %64 = vector.shape_cast %63 : vector<4x4x288xf32> to vector<16x288xf32>
    %c0_79 = arith.constant 0 : index
    %c0_80 = arith.constant 0 : index
    %65 = vector.load %arg4[%c0_79, %c0_80] : memref<288x64xf32, #tpu.memory_space<vmem>>, vector<288x64xf32>
    %66 = vector.extract_strided_slice %0 {offsets = [6, 0], sizes = [1, 64], strides = [1, 1]} : vector<16x128xf32> to vector<1x64xf32>
    %67 = vector.extract_strided_slice %0 {offsets = [7, 0], sizes = [1, 64], strides = [1, 1]} : vector<16x128xf32> to vector<1x64xf32>
    %68 = vector.extract_strided_slice %0 {offsets = [8, 0], sizes = [1, 64], strides = [1, 1]} : vector<16x128xf32> to vector<1x64xf32>
    %cst_81 = arith.constant dense<0.000000e+00> : vector<16x64xf32>
    %69 = tpu.matmul %64, %65, %cst_81 {dimension_numbers = #tpu.dot_dimension_numbers<[1], [0], [0], [1], [0, 0, 1, 1], [], []>} : vector<16x288xf32>, vector<288x64xf32>, vector<16x64xf32> -> vector<16x64xf32>
    %70 = vector.broadcast %66 : vector<1x64xf32> to vector<16x64xf32>
    %71 = arith.addf %69, %70 : vector<16x64xf32>
    %cst_82 = arith.constant 0.000000e+00 : f32
    %72 = vector.broadcast %cst_82 : f32 to vector<16x64xf32>
    %73 = arith.cmpf ogt, %71, %72 : vector<16x64xf32>
    %cst_83 = arith.constant 2.000000e-01 : f32
    %74 = vector.broadcast %cst_83 : f32 to vector<16x64xf32>
    %75 = arith.mulf %74, %71 : vector<16x64xf32>
    %76 = arith.select %73, %71, %75 : vector<16x64xi1>, vector<16x64xf32>
    %77 = vector.broadcast %67 : vector<1x64xf32> to vector<16x64xf32>
    %78 = arith.mulf %76, %77 : vector<16x64xf32>
    %79 = vector.broadcast %68 : vector<1x64xf32> to vector<16x64xf32>
    %80 = arith.addf %78, %79 : vector<16x64xf32>
    %cst_84 = arith.constant 0.000000e+00 : f32
    %81 = vector.broadcast %cst_84 : f32 to vector<6x6x64xf32>
    %c0_85 = arith.constant 0 : index
    %c0_86 = arith.constant 0 : index
    %c0_87 = arith.constant 0 : index
    %82 = vector.load %arg11[%c0_85, %c0_86, %c0_87] : memref<6x6x64xf32, #tpu.memory_space<vmem>>, vector<6x6x64xf32>
    tpu.vector_store %arg11[%c0_85, %c0_86, %c0_87], %81 {strides = array<i32>} : memref<6x6x64xf32, #tpu.memory_space<vmem>>, vector<6x6x64xf32>,
    %83 = vector.shape_cast %80 : vector<16x64xf32> to vector<4x4x64xf32>
    %c1_88 = arith.constant 1 : index
    %c1_89 = arith.constant 1 : index
    %c0_90 = arith.constant 0 : index
    %84 = vector.load %arg11[%c1_88, %c1_89, %c0_90] : memref<6x6x64xf32, #tpu.memory_space<vmem>>, vector<4x4x64xf32>
    tpu.vector_store %arg11[%c1_88, %c1_89, %c0_90], %83 {strides = array<i32>} : memref<6x6x64xf32, #tpu.memory_space<vmem>>, vector<4x4x64xf32>,
    %c0_91 = arith.constant 0 : index
    %c0_92 = arith.constant 0 : index
    %c0_93 = arith.constant 0 : index
    %85 = tpu.strided_load %arg11[%c0_91, %c0_92, %c0_93] {strides = array<i32: 2, 2, 1>} : memref<6x6x64xf32, #tpu.memory_space<vmem>>, vector<2x2x64xf32>
    %c0_94 = arith.constant 0 : index
    %c1_95 = arith.constant 1 : index
    %c0_96 = arith.constant 0 : index
    %86 = tpu.strided_load %arg11[%c0_94, %c1_95, %c0_96] {strides = array<i32: 2, 2, 1>} : memref<6x6x64xf32, #tpu.memory_space<vmem>>, vector<2x2x64xf32>
    %c0_97 = arith.constant 0 : index
    %c2_98 = arith.constant 2 : index
    %c0_99 = arith.constant 0 : index
    %87 = tpu.strided_load %arg11[%c0_97, %c2_98, %c0_99] {strides = array<i32: 2, 2, 1>} : memref<6x6x64xf32, #tpu.memory_space<vmem>>, vector<2x2x64xf32>
    %c1_100 = arith.constant 1 : index
    %c0_101 = arith.constant 0 : index
    %c0_102 = arith.constant 0 : index
    %88 = tpu.strided_load %arg11[%c1_100, %c0_101, %c0_102] {strides = array<i32: 2, 2, 1>} : memref<6x6x64xf32, #tpu.memory_space<vmem>>, vector<2x2x64xf32>
    %c1_103 = arith.constant 1 : index
    %c1_104 = arith.constant 1 : index
    %c0_105 = arith.constant 0 : index
    %89 = tpu.strided_load %arg11[%c1_103, %c1_104, %c0_105] {strides = array<i32: 2, 2, 1>} : memref<6x6x64xf32, #tpu.memory_space<vmem>>, vector<2x2x64xf32>
    %c1_106 = arith.constant 1 : index
    %c2_107 = arith.constant 2 : index
    %c0_108 = arith.constant 0 : index
    %90 = tpu.strided_load %arg11[%c1_106, %c2_107, %c0_108] {strides = array<i32: 2, 2, 1>} : memref<6x6x64xf32, #tpu.memory_space<vmem>>, vector<2x2x64xf32>
    %c2_109 = arith.constant 2 : index
    %c0_110 = arith.constant 0 : index
    %c0_111 = arith.constant 0 : index
    %91 = tpu.strided_load %arg11[%c2_109, %c0_110, %c0_111] {strides = array<i32: 2, 2, 1>} : memref<6x6x64xf32, #tpu.memory_space<vmem>>, vector<2x2x64xf32>
    %c2_112 = arith.constant 2 : index
    %c1_113 = arith.constant 1 : index
    %c0_114 = arith.constant 0 : index
    %92 = tpu.strided_load %arg11[%c2_112, %c1_113, %c0_114] {strides = array<i32: 2, 2, 1>} : memref<6x6x64xf32, #tpu.memory_space<vmem>>, vector<2x2x64xf32>
    %c2_115 = arith.constant 2 : index
    %c2_116 = arith.constant 2 : index
    %c0_117 = arith.constant 0 : index
    %93 = tpu.strided_load %arg11[%c2_115, %c2_116, %c0_117] {strides = array<i32: 2, 2, 1>} : memref<6x6x64xf32, #tpu.memory_space<vmem>>, vector<2x2x64xf32>
    %94 = tpu.concatenate %85, %86, %87, %88, %89, %90, %91, %92, %93 in 2 : vector<2x2x64xf32>, vector<2x2x64xf32>, vector<2x2x64xf32>, vector<2x2x64xf32>, vector<2x2x64xf32>, vector<2x2x64xf32>, vector<2x2x64xf32>, vector<2x2x64xf32>, vector<2x2x64xf32> -> vector<2x2x576xf32>
    %95 = vector.shape_cast %94 : vector<2x2x576xf32> to vector<4x576xf32>
    %c0_118 = arith.constant 0 : index
    %c0_119 = arith.constant 0 : index
    %96 = vector.load %arg5[%c0_118, %c0_119] : memref<576x128xf32, #tpu.memory_space<vmem>>, vector<576x128xf32>
    %97 = vector.extract_strided_slice %0 {offsets = [9, 0], sizes = [1, 128], strides = [1, 1]} : vector<16x128xf32> to vector<1x128xf32>
    %98 = vector.extract_strided_slice %0 {offsets = [10, 0], sizes = [1, 128], strides = [1, 1]} : vector<16x128xf32> to vector<1x128xf32>
    %99 = vector.extract_strided_slice %0 {offsets = [11, 0], sizes = [1, 128], strides = [1, 1]} : vector<16x128xf32> to vector<1x128xf32>
    %cst_120 = arith.constant dense<0.000000e+00> : vector<4x128xf32>
    %100 = tpu.matmul %95, %96, %cst_120 {dimension_numbers = #tpu.dot_dimension_numbers<[1], [0], [0], [1], [0, 0, 1, 1], [], []>} : vector<4x576xf32>, vector<576x128xf32>, vector<4x128xf32> -> vector<4x128xf32>
    %101 = vector.broadcast %97 : vector<1x128xf32> to vector<4x128xf32>
    %102 = arith.addf %100, %101 : vector<4x128xf32>
    %cst_121 = arith.constant 0.000000e+00 : f32
    %103 = vector.broadcast %cst_121 : f32 to vector<4x128xf32>
    %104 = arith.cmpf ogt, %102, %103 : vector<4x128xf32>
    %cst_122 = arith.constant 2.000000e-01 : f32
    %105 = vector.broadcast %cst_122 : f32 to vector<4x128xf32>
    %106 = arith.mulf %105, %102 : vector<4x128xf32>
    %107 = arith.select %104, %102, %106 : vector<4x128xi1>, vector<4x128xf32>
    %108 = vector.broadcast %98 : vector<1x128xf32> to vector<4x128xf32>
    %109 = arith.mulf %107, %108 : vector<4x128xf32>
    %110 = vector.broadcast %99 : vector<1x128xf32> to vector<4x128xf32>
    %111 = arith.addf %109, %110 : vector<4x128xf32>
    %c0_123 = arith.constant 0 : index
    %c0_124 = arith.constant 0 : index
    %112 = vector.load %arg6[%c0_123, %c0_124] : memref<4x128xf32, #tpu.memory_space<vmem>>, vector<4x128xf32>
    %113 = arith.mulf %111, %112 : vector<4x128xf32>
    %cst_125 = arith.constant dense<0.000000e+00> : vector<4xf32>
    %114 = vector.multi_reduction <add>, %113, %cst_125 [1] : vector<4x128xf32> to vector<4xf32>
    %115 = vector.shape_cast %114 : vector<4xf32> to vector<4x1xf32>
    %cst_126 = arith.constant dense<0.000000e+00> : vector<1xf32>
    %116 = vector.multi_reduction <add>, %115, %cst_126 [0] : vector<4x1xf32> to vector<1xf32>
    %117 = vector.shape_cast %116 : vector<1xf32> to vector<1x1xf32>
    %118 = vector.extract_strided_slice %0 {offsets = [12, 0], sizes = [1, 1], strides = [1, 1]} : vector<16x128xf32> to vector<1x1xf32>
    %119 = arith.addf %117, %118 : vector<1x1xf32>
    %cst_127 = arith.constant 0.000000e+00 : f32
    %120 = vector.broadcast %cst_127 : f32 to vector<1x1xf32>
    %121 = arith.subf %120, %119 : vector<1x1xf32>
    %122 = math.exp %121 : vector<1x1xf32>
    %cst_128 = arith.constant 1.000000e+00 : f32
    %123 = vector.broadcast %cst_128 : f32 to vector<1x1xf32>
    %124 = arith.addf %123, %122 : vector<1x1xf32>
    %cst_129 = arith.constant 1.000000e+00 : f32
    %125 = vector.broadcast %cst_129 : f32 to vector<1x1xf32>
    %126 = arith.divf %125, %124 : vector<1x1xf32>
    %127 = vector.shape_cast %126 : vector<1x1xf32> to vector<1x1xf32>
    %128 = vector.broadcast %127 : vector<1x1xf32> to vector<1x128xf32>
    %c0_130 = arith.constant 0 : index
    %c0_131 = arith.constant 0 : index
    %c0_132 = arith.constant 0 : index
    %129 = vector.load %arg8[%c0_130, %c0_131, %c0_132] : memref<1x1x128xf32, #tpu.memory_space<vmem>>, vector<1x1x128xf32>
    %130 = vector.shape_cast %129 : vector<1x1x128xf32> to vector<1x128xf32>
    %131 = vector.shape_cast %128 : vector<1x128xf32> to vector<1x1x128xf32>
    tpu.vector_store %arg8[%c0_130, %c0_131, %c0_132], %131 {strides = array<i32>} : memref<1x1x128xf32, #tpu.memory_space<vmem>>, vector<1x1x128xf32>,
    return
  }
  func.func @transform_0(%arg0: i32) -> (i32, i32, i32) {
    %c0_i32 = arith.constant 0 : i32
    %c0_i32_0 = arith.constant 0 : i32
    %c0_i32_1 = arith.constant 0 : i32
    return %arg0, %c0_i32, %c0_i32_0 : i32, i32, i32
  }
  func.func @transform_1(%arg0: i32) -> (i32, i32) {
    %c0_i32 = arith.constant 0 : i32
    %c0_i32_0 = arith.constant 0 : i32
    %c0_i32_1 = arith.constant 0 : i32
    return %c0_i32, %c0_i32_0 : i32, i32
  }
  func.func @transform_2(%arg0: i32) -> (i32, i32) {
    %c0_i32 = arith.constant 0 : i32
    %c0_i32_0 = arith.constant 0 : i32
    %c0_i32_1 = arith.constant 0 : i32
    return %c0_i32, %c0_i32_0 : i32, i32
  }
  func.func @transform_3(%arg0: i32) -> (i32, i32) {
    %c0_i32 = arith.constant 0 : i32
    %c0_i32_0 = arith.constant 0 : i32
    %c0_i32_1 = arith.constant 0 : i32
    return %c0_i32, %c0_i32_0 : i32, i32
  }
  func.func @transform_4(%arg0: i32) -> (i32, i32) {
    %c0_i32 = arith.constant 0 : i32
    %c0_i32_0 = arith.constant 0 : i32
    %c0_i32_1 = arith.constant 0 : i32
    return %c0_i32, %c0_i32_0 : i32, i32
  }
  func.func @transform_5(%arg0: i32) -> (i32, i32) {
    %c0_i32 = arith.constant 0 : i32
    %c0_i32_0 = arith.constant 0 : i32
    %c0_i32_1 = arith.constant 0 : i32
    return %c0_i32, %c0_i32_0 : i32, i32
  }
  func.func @transform_6(%arg0: i32) -> (i32, i32) {
    %c0_i32 = arith.constant 0 : i32
    %c0_i32_0 = arith.constant 0 : i32
    %c0_i32_1 = arith.constant 0 : i32
    return %c0_i32, %c0_i32_0 : i32, i32
  }
  func.func @transform_7(%arg0: i32) -> (i32, i32, i32) {
    %c0_i32 = arith.constant 0 : i32
    %c0_i32_0 = arith.constant 0 : i32
    %c0_i32_1 = arith.constant 0 : i32
    return %arg0, %c0_i32, %c0_i32_0 : i32, i32, i32
  }
}

</mosaic_0001>

<bundles_post_ra>
// kernel: discriminator_4ca.1
= control target key start
LH: loop header
LB: loop body
LE: loop exit
PB: predicated region body
PF: predicated region fallthrough
CT: control target
= control target key end

     0   :  { %s3279_s24 = smov 0   ;;  %s4343_s0 = inlined_call_operand.vmem [shape: f32[2,256,9], index: 0, kind: input, shape index: {}]   ;;  %s4344_s1 = inlined_call_operand.vmem [shape: f32[9,16], index: 1, kind: input, shape index: {}]   ;;  %s4345_s2 = inlined_call_operand.vmem [shape: f32[144,32], index: 2, kind: input, shape index: {}]   ;;  %s4346_s3 = inlined_call_operand.vmem [shape: f32[288,64], index: 3, kind: input, shape index: {}]   ;;  %s4347_s4 = inlined_call_operand.vmem [shape: f32[576,128], index: 4, kind: input, shape index: {}]   ;;  %s4348_s5 = inlined_call_operand.vmem [shape: f32[4,128], index: 5, kind: input, shape index: {}]   ;;  %s4349_s6 = inlined_call_operand.vmem [shape: f32[16,128], index: 6, kind: input, shape index: {}]   ;;  %s4350_s7 = inlined_call_operand.vmem [shape: f32[2,1,128], index: 7, kind: output, shape index: {}]  }
   0x1 LB: > { %s2616_s25 = sadd.s32 4294967295, %s3224_s24   ;;  %p2620_p0 = scmp.ge.s32.totalorder %s3224_s24, 1  ;;  %s3224_s24 = sphi %s3279_s24, %s17_s24  }
   0x2   : > { %p237_p1 = scmp.lt.s32.totalorder %s3224_s24, 3 }
   0x4   : > { %p238_p2 = pnand %p2620_p0, %p237_p1 }
   0x5   : > { %v309_v0 = vld [vmem:[%s4344_s1] sm:$0xff] (!%p238_p2)  ;;  %v310_v1 = vld [vmem:[%s4344_s1 + $0x8] sm:$0x1] (!%p238_p2)  ;;  %vm412_vm0 = vcmask (!%p238_p2), 1040384   ;;  %p267_p3 = scmp.lt.s32.totalorder (!%p238_p2), %s2616_s25, 1  ;;  %vm3226_vm1 = vmmov (!%p238_p2), 1   ;;  %v311_v46 = vlaneseq (!%p238_p2) }
   0x6   : > { %241 = sbr.rel (%p238_p2) target bundleno = 1733 (0x6c5), region = 48  ;;  %v2915_v2 = vpack.c.bf16 (!%p238_p2), %v310_v1, %v309_v0  ;;  %vm2916_vm2 = vmpackc.low (!%p238_p2), %vm412_vm0, %vm3226_vm1  ;;  %vm315_vm3 = vcmask (!%p238_p2), 72704   ;;  %vm809_vm4 = vcmask (!%p238_p2), 130048   ;;  %vm812_vm5 = vcmask (!%p238_p2), 123904   ;;  %v1326_v36 = vld [vmem:[%s4345_s2] sm:$0xff] (!%p238_p2)  ;;  %v1327_v37 = vld [vmem:[%s4345_s2 + $0x8] sm:$0xff] (!%p238_p2) }
   0x7   : > { %v3227_v35 = vmov (!%p238_p2), 0.0   ;;  %v1328_v38 = vld [vmem:[%s4345_s2 + $0x10] sm:$0xff] (!%p238_p2)  ;;  %v3228_v39 = vmov (!%p238_p2), 0.0|0.0   ;;  %v2922_v40 = vpack.c.bf16 (!%p238_p2), %v1327_v37, %v1326_v36  ;;  %v1329_v41 = vld [vmem:[%s4345_s2 + $0x18] sm:$0xff] (!%p238_p2)  ;;  %v1330_v43 = vld [vmem:[%s4345_s2 + $0x20] sm:$0xff] (!%p238_p2)  ;;  %v3489_v47 = vshrl.u32 (!%p238_p2), %v311_v46, 7 }
   0x8   : > { %2917 = vmatprep.subr.msk.bf16.mxu0 (!%p238_p2), %vm2916_vm2, %v2915_v2  ;;  %3064 = vmatprep.subr.msk.bf16.mxu1 (!%p238_p2), %vm2916_vm2, %v2915_v2  ;;  %815 = vst.msk [vmem:[#allocation2 + $0x20] sm:$0xff] (!%p238_p2), %vm809_vm4, %v3227_v35  ;;  %810 = vst.msk [vmem:[#allocation2] sm:$0xff] (!%p238_p2), %vm809_vm4, %v3227_v35  ;;  %v2925_v42 = vpack.c.bf16 (!%p238_p2), %v1329_v41, %v1328_v38  ;;  %v1331_v44 = vld [vmem:[%s4345_s2 + $0x28] sm:$0xff] (!%p238_p2)  ;;  %v275_v49 = vld [vmem:[%s4349_s6] sm:$0xff] (!%p238_p2)  ;;  %s3229_s27 = smov (!%p238_p2), 16   ;;  %s3230_s28 = smov (!%p238_p2), 32  }
   0x9   : > { %2920 = vmatpush3.bf16.msk.msra.mxu0 (!%p238_p2), %vm2916_vm2, %v2915_v2  ;;  %3065 = vmatpush3.bf16.msk.msra.mxu1 (!%p238_p2), %vm2916_vm2, %v2915_v2  ;;  %816 = vst.msk [vmem:[#allocation2 + $0x28] sm:$0x3] (!%p238_p2), %vm812_vm5, %v3227_v35  ;;  %813 = vst.msk [vmem:[#allocation2 + $0x10] sm:$0x3] (!%p238_p2), %vm812_vm5, %v3227_v35  ;;  %v2928_v45 = vpack.c.bf16 (!%p238_p2), %v1331_v44, %v1330_v43  ;;  %v313_v48 = vsub.s32 (!%p238_p2), 0, %v3489_v47  ;;  %v739_v51 = vsub.s32 (!%p238_p2), 1, %v3489_v47 }
   0xa   : > { %811 = vst.msk [vmem:[#allocation2 + $0x8] sm:$0xff] (!%p238_p2), %vm809_vm4, %v3227_v35  ;;  %814 = vst.msk [vmem:[#allocation2 + $0x18] sm:$0xff] (!%p238_p2), %vm809_vm4, %v3227_v35  ;;  %2921 = vmatprep.subr.bf16.mxu1 (!%p238_p2), %v3228_v39  ;;  %v775_v53 = vsub.s32 (!%p238_p2), 2, %v3489_v47  ;;  %s3231_s29 = smov (!%p238_p2), 48   ;;  %s3232_s11 = smov (!%p238_p2), 80  }
   0xb   : > { %817 = vst.msk [vmem:[#allocation2 + $0x30] sm:$0xff] (!%p238_p2), %vm809_vm4, %v3227_v35  ;;  %818 = vst.msk [vmem:[#allocation2 + $0x38] sm:$0xff] (!%p238_p2), %vm809_vm4, %v3227_v35  ;;  %v3497_v50 = vrot.slane (!%p238_p2), %v275_v49, %v313_v48  ;;  %v3505_v59 = vrot.slane (!%p238_p2), %v275_v49, %v739_v51  ;;  %s3233_s16 = smov (!%p238_p2), 64   ;;  %s3235_s8 = smov (!%p238_p2), 112  }
   0xc   : > { %819 = vst.msk [vmem:[#allocation2 + $0x40] sm:$0x3] (!%p238_p2), %vm812_vm5, %v3227_v35  ;;  %822 = vst.msk [vmem:[#allocation2 + $0x58] sm:$0x3] (!%p238_p2), %vm812_vm5, %v3227_v35  ;;  %v3511_v0 = vrot.slane (!%p238_p2), %v275_v49, %v775_v53 }
   0xd   : > { %s4352_s25 = smov (!%p267_p3, %s2616_s25), 1  ;;  %820 = vst.msk [vmem:[#allocation2 + $0x48] sm:$0xff] %vm809_vm4, %v3227_v35  ;;  %821 = vst.msk [vmem:[#allocation2 + $0x50] sm:$0xff] %vm809_vm4, %v3227_v35 }
   0xe   : > { %s2675_s30 = sshll.u32 %s4352_s25, 8  ;;  %823 = vst.msk [vmem:[#allocation2 + $0x60] sm:$0xff] %vm809_vm4, %v3227_v35  ;;  %824 = vst.msk [vmem:[#allocation2 + $0x68] sm:$0xff] %vm809_vm4, %v3227_v35 }
   0xf   : > { %s3299_s10 = scalar_lea.vmem %s4343_s0, %s2675_s30  ;;  %825 = vst.msk [vmem:[#allocation2 + $0x70] sm:$0x3] %vm812_vm5, %v3227_v35  ;;  %828 = vst.msk [vmem:[#allocation2 + $0x88] sm:$0x3] %vm812_vm5, %v3227_v35  ;;  %s3234_s30 = smov 96  }
  0x10   : > { %v277_v3 = vld [vmem:[%s3299_s10] sm:$0xff]  ;;  %v278_v5 = vld [vmem:[%s3299_s10 + $0x8] sm:$0xff]  ;;  %v279_v7 = vld [vmem:[%s3299_s10 + $0x10] sm:$0xff]  ;;  %826 = vst.msk [vmem:[#allocation2 + $0x78] sm:$0xff] %vm809_vm4, %v3227_v35 }
  0x11   : > { %v293_v4 = vld [vmem:[%s3299_s10 + $0x80] sm:$0xff]  ;;  %2837 = vmatprep.mubr.msk.f32.mxu0 %vm315_vm3, %v277_v3  ;;  %v294_v6 = vld [vmem:[%s3299_s10 + $0x88] sm:$0xff]  ;;  %v295_v8 = vld [vmem:[%s3299_s10 + $0x90] sm:$0xff]  ;;  %827 = vst.msk [vmem:[#allocation2 + $0x80] sm:$0xff] %vm809_vm4, %v3227_v35 }
  0x12   : > { %2861 = vmatprep.mubr.msk.f32.mxu1 %vm315_vm3, %v293_v4  ;;  %2838 = vmatmul.mubr.msk.f32.vlgmr.msra.gmra.mrb[0].mxu0 %vm315_vm3, %v278_v5  ;;  %v280_v9 = vld [vmem:[%s3299_s10 + $0x18] sm:$0xff]  ;;  %v281_v11 = vld [vmem:[%s3299_s10 + $0x20] sm:$0xff]  ;;  %v282_v13 = vld [vmem:[%s3299_s10 + $0x28] sm:$0xff]  ;;  %829 = vst.msk [vmem:[#allocation2 + $0x90] sm:$0xff] %vm809_vm4, %v3227_v35 }
  0x13   : > { %2862 = vmatmul.mubr.msk.f32.vlgmr.msra.gmra.mrb[0].mxu1 %vm315_vm3, %v294_v6  ;;  %2840 = vmatprep.mubr.msk.f32.mxu0 %vm315_vm3, %v279_v7  ;;  %v296_v10 = vld [vmem:[%s3299_s10 + $0x98] sm:$0xff]  ;;  %v297_v12 = vld [vmem:[%s3299_s10 + $0xa0] sm:$0xff]  ;;  %v298_v14 = vld [vmem:[%s3299_s10 + $0xa8] sm:$0xff]  ;;  %830 = vst.msk [vmem:[#allocation2 + $0x98] sm:$0xff] %vm809_vm4, %v3227_v35 }
  0x14   : > { %2864 = vmatprep.mubr.msk.f32.mxu1 %vm315_vm3, %v295_v8  ;;  %v283_v15 = vld [vmem:[%s3299_s10 + $0x30] sm:$0xff]  ;;  %v284_v17 = vld [vmem:[%s3299_s10 + $0x38] sm:$0xff]  ;;  %v285_v19 = vld [vmem:[%s3299_s10 + $0x40] sm:$0xff]  ;;  %831 = vst.msk [vmem:[#allocation2 + $0xa0] sm:$0x3] %vm812_vm5, %v3227_v35  ;;  %2923 = vmatpush1.bf16.msra.mxu1 %v2922_v40 }
  0x15   : > { %v299_v16 = vld [vmem:[%s3299_s10 + $0xb0] sm:$0xff]  ;;  %v300_v18 = vld [vmem:[%s3299_s10 + $0xb8] sm:$0xff]  ;;  %v301_v20 = vld [vmem:[%s3299_s10 + $0xc0] sm:$0xff]  ;;  %832 = vst.msk [vmem:[#allocation2 + $0xa8] sm:$0xff] %vm809_vm4, %v3227_v35  ;;  %2924 = vmatprep.subr.bf16.mxu1 %v3228_v39 }
  0x16   : > { %2841 = vmatmul.mubr.msk.f32.gmra.mrb[2].mxu0 %vm315_vm3, %v280_v9  ;;  %v286_v21 = vld [vmem:[%s3299_s10 + $0x48] sm:$0xff]  ;;  %v287_v23 = vld [vmem:[%s3299_s10 + $0x50] sm:$0xff]  ;;  %v288_v25 = vld [vmem:[%s3299_s10 + $0x58] sm:$0xff]  ;;  %833 = vst.msk [vmem:[#allocation2 + $0xb0] sm:$0xff] %vm809_vm4, %v3227_v35 }
  0x17   : > { %2865 = vmatmul.mubr.msk.f32.gmra.mrb[2].mxu1 %vm315_vm3, %v296_v10  ;;  %2843 = vmatprep.mubr.msk.f32.mxu0 %vm315_vm3, %v281_v11  ;;  %v302_v22 = vld [vmem:[%s3299_s10 + $0xc8] sm:$0xff]  ;;  %v303_v24 = vld [vmem:[%s3299_s10 + $0xd0] sm:$0xff]  ;;  %v304_v26 = vld [vmem:[%s3299_s10 + $0xd8] sm:$0xff]  ;;  %834 = vst.msk [vmem:[#allocation2 + $0xb8] sm:$0x3] %vm812_vm5, %v3227_v35 }
  0x18   : > { %2867 = vmatprep.mubr.msk.f32.mxu1 %vm315_vm3, %v297_v12  ;;  %v289_v27 = vld [vmem:[%s3299_s10 + $0x60] sm:$0xff]  ;;  %v290_v29 = vld [vmem:[%s3299_s10 + $0x68] sm:$0xff]  ;;  %v291_v31 = vld [vmem:[%s3299_s10 + $0x70] sm:$0xff]  ;;  %835 = vst.msk [vmem:[#allocation2 + $0xc0] sm:$0xff] %vm809_vm4, %v3227_v35  ;;  %2926 = vmatpush1.bf16.msra.mxu1 %v2925_v42 }
  0x19   : > { %v305_v28 = vld [vmem:[%s3299_s10 + $0xe0] sm:$0xff]  ;;  %v306_v30 = vld [vmem:[%s3299_s10 + $0xe8] sm:$0xff]  ;;  %v307_v32 = vld [vmem:[%s3299_s10 + $0xf0] sm:$0xff]  ;;  %836 = vst.msk [vmem:[#allocation2 + $0xc8] sm:$0xff] %vm809_vm4, %v3227_v35  ;;  %2927 = vmatprep.subr.bf16.mxu1 %v3228_v39 }
  0x1a   : > { %2844 = vmatmul.mubr.msk.f32.gmra.mrb[4].mxu0 %vm315_vm3, %v282_v13  ;;  %v292_v33 = vld [vmem:[%s3299_s10 + $0x78] sm:$0xff]  ;;  %837 = vst.msk [vmem:[#allocation2 + $0xd0] sm:$0x3] %vm812_vm5, %v3227_v35  ;;  %840 = vst.msk [vmem:[#allocation2 + $0xe8] sm:$0x3] %vm812_vm5, %v3227_v35 }
  0x1b   : > { %2868 = vmatmul.mubr.msk.f32.gmra.mrb[4].mxu1 %vm315_vm3, %v298_v14  ;;  %2846 = vmatprep.mubr.msk.f32.mxu0 %vm315_vm3, %v283_v15  ;;  %v308_v34 = vld [vmem:[%s3299_s10 + $0xf8] sm:$0xff]  ;;  %838 = vst.msk [vmem:[#allocation2 + $0xd8] sm:$0xff] %vm809_vm4, %v3227_v35  ;;  %839 = vst.msk [vmem:[#allocation2 + $0xe0] sm:$0xff] %vm809_vm4, %v3227_v35 }
  0x1c   : > { %2870 = vmatprep.mubr.msk.f32.mxu1 %vm315_vm3, %v299_v16  ;;  %841 = vst.msk [vmem:[#allocation2 + $0xf0] sm:$0xff] %vm809_vm4, %v3227_v35  ;;  %842 = vst.msk [vmem:[#allocation2 + $0xf8] sm:$0xff] %vm809_vm4, %v3227_v35  ;;  %2929 = vmatpush1.bf16.msra.mxu1 %v2928_v45 }
  0x1d   : > { %843 = vst.msk [vmem:[#allocation2 + $0x100] sm:$0x3] %vm812_vm5, %v3227_v35  ;;  %846 = vst.msk [vmem:[#allocation2 + $0x118] sm:$0x3] %vm812_vm5, %v3227_v35  ;;  %2930 = vmatprep.subr.bf16.mxu1 %v3228_v39 }
  0x1e   : > { %2847 = vmatmul.mubr.msk.f32.gmra.mrb[6].mxu0 %vm315_vm3, %v284_v17  ;;  %844 = vst.msk [vmem:[#allocation2 + $0x108] sm:$0xff] %vm809_vm4, %v3227_v35  ;;  %845 = vst.msk [vmem:[#allocation2 + $0x110] sm:$0xff] %vm809_vm4, %v3227_v35 }
  0x1f   : > { %2871 = vmatmul.mubr.msk.f32.gmra.mrb[6].mxu1 %vm315_vm3, %v300_v18  ;;  %2849 = vmatprep.mubr.msk.f32.mxu0 %vm315_vm3, %v285_v19  ;;  %847 = vst.msk [vmem:[#allocation2 + $0x120] sm:$0xff] %vm809_vm4, %v3227_v35  ;;  %848 = vst.msk [vmem:[#allocation2 + $0x128] sm:$0xff] %vm809_vm4, %v3227_v35 }
  0x20   : > { %2873 = vmatprep.mubr.msk.f32.mxu1 %vm315_vm3, %v301_v20  ;;  %849 = vst.msk [vmem:[#allocation2 + $0x130] sm:$0x3] %vm812_vm5, %v3227_v35  ;;  %852 = vst.msk [vmem:[#allocation2 + $0x148] sm:$0x3] %vm812_vm5, %v3227_v35 }
  0x21   : > { %850 = vst.msk [vmem:[#allocation2 + $0x138] sm:$0xff] %vm809_vm4, %v3227_v35  ;;  %851 = vst.msk [vmem:[#allocation2 + $0x140] sm:$0xff] %vm809_vm4, %v3227_v35 }
  0x22   : > { %2850 = vmatmul.mubr.msk.f32.gmra.mrb[8].mxu0 %vm315_vm3, %v286_v21  ;;  %853 = vst.msk [vmem:[#allocation2 + $0x150] sm:$0xff] %vm809_vm4, %v3227_v35  ;;  %854 = vst.msk [vmem:[#allocation2 + $0x158] sm:$0xff] %vm809_vm4, %v3227_v35 }
  0x23   : > { %2874 = vmatmul.mubr.msk.f32.gmra.mrb[8].mxu1 %vm315_vm3, %v302_v22  ;;  %2852 = vmatprep.mubr.msk.f32.mxu0 %vm315_vm3, %v287_v23  ;;  %855 = vst.msk [vmem:[#allocation2 + $0x160] sm:$0x3] %vm812_vm5, %v3227_v35  ;;  %858 = vst.msk [vmem:[#allocation2 + $0x178] sm:$0x3] %vm812_vm5, %v3227_v35 }
  0x24   : > { %2876 = vmatprep.mubr.msk.f32.mxu1 %vm315_vm3, %v303_v24  ;;  %856 = vst.msk [vmem:[#allocation2 + $0x168] sm:$0xff] %vm809_vm4, %v3227_v35  ;;  %857 = vst.msk [vmem:[#allocation2 + $0x170] sm:$0xff] %vm809_vm4, %v3227_v35 }
  0x25   : > { %859 = vst.msk [vmem:[#allocation2 + $0x180] sm:$0xff] %vm809_vm4, %v3227_v35  ;;  %860 = vst.msk [vmem:[#allocation2 + $0x188] sm:$0xff] %vm809_vm4, %v3227_v35 }
  0x26   : > { %2853 = vmatmul.mubr.msk.f32.gmra.mrb[10].mxu0 %vm315_vm3, %v288_v25  ;;  %861 = vst.msk [vmem:[#allocation2 + $0x190] sm:$0x3] %vm812_vm5, %v3227_v35 }
  0x27   : > { %2877 = vmatmul.mubr.msk.f32.gmra.mrb[10].mxu1 %vm315_vm3, %v304_v26  ;;  %2855 = vmatprep.mubr.msk.f32.mxu0 %vm315_vm3, %v289_v27 }
  0x28   : > { %2879 = vmatprep.mubr.msk.f32.mxu1 %vm315_vm3, %v305_v28 }
  0x2a   : > { %2856 = vmatmul.mubr.msk.f32.gmra.mrb[12].mxu0 %vm315_vm3, %v290_v29 }
  0x2b   : > { %2880 = vmatmul.mubr.msk.f32.gmra.mrb[12].mxu1 %vm315_vm3, %v306_v30  ;;  %2858 = vmatprep.mubr.msk.f32.mxu0 %vm315_vm3, %v291_v31 }
  0x2c   : > { %2882 = vmatprep.mubr.msk.f32.mxu1 %vm315_vm3, %v307_v32 }
  0x2e   : > { %2859 = vmatmul.mubr.msk.f32.gmra.mrb[14].mxu0 %vm315_vm3, %v292_v33 }
  0x2f   : > { %2883 = vmatmul.mubr.msk.f32.gmra.mrb[14].mxu1 %vm315_vm3, %v308_v34 }
  0xe5   : > { %v2839_v52 = vpop.f32.mrb[0].mxu0 }
  0xe6   : > { %v2863_v54 = vpop.f32.mrb[0].mxu1  ;;  %v488_v55 = vadd.f32 %v2839_v52, %v3497_v50  ;;  %v482_v56 = vpop.f32.mrb[1].mxu0 }
  0xe7   : > { %v568_v57 = vadd.f32 %v2863_v54, %v3497_v50  ;;  %v562_v58 = vpop.f32.mrb[1].mxu1  ;;  %v483_v60 = vadd.f32 %v482_v56, %v3497_v50 }
  0xe8   : > { %v563_v61 = vadd.f32 %v562_v58, %v3497_v50  ;;  %vm642_vm6 = vcmp.gt.f32.partialorder %v488_v55, 0.0  ;;  %v674_v62 = vmul.f32 0.2, %v488_v55 }
  0xe9   : > { %vm658_vm7 = vcmp.gt.f32.partialorder %v568_v57, 0.0  ;;  %v690_v63 = vmul.f32 0.2, %v568_v57  ;;  %vm641_vm8 = vcmp.gt.f32.partialorder %v483_v60, 0.0  ;;  %v673_v1 = vmul.f32 0.2, %v483_v60 }
  0xea   : > { %v2842_v2 = vpop.f32.mrb[2].mxu0  ;;  %vm657_vm9 = vcmp.gt.f32.partialorder %v563_v61, 0.0  ;;  %v2866_v3 = vpop.f32.mrb[2].mxu1  ;;  %v706_v4 = vsel %vm642_vm6, %v488_v55, %v674_v62  ;;  %v689_v8 = vmul.f32 0.2, %v563_v61 }
  0xeb   : > { %v498_v5 = vadd.f32 %v2842_v2, %v3497_v50  ;;  %v722_v6 = vsel %vm658_vm7, %v568_v57, %v690_v63  ;;  %v492_v7 = vpop.f32.mrb[3].mxu0  ;;  %v572_v9 = vpop.f32.mrb[3].mxu1  ;;  %v742_v10 = vmul.f32 %v3505_v59, %v706_v4  ;;  %v705_v11 = vsel %vm641_vm8, %v483_v60, %v673_v1 }
  0xec   : > { %v758_v12 = vmul.f32 %v3505_v59, %v722_v6  ;;  %v493_v13 = vadd.f32 %v492_v7, %v3497_v50  ;;  %v741_v14 = vmul.f32 %v3505_v59, %v705_v11  ;;  %v721_v16 = vsel %vm657_vm9, %v563_v61, %v689_v8 }
  0xed   : > { %vm644_vm10 = vcmp.gt.f32.partialorder %v498_v5, 0.0  ;;  %v676_v15 = vmul.f32 0.2, %v498_v5  ;;  %v778_v17 = vadd.f32 %v3511_v0, %v742_v10  ;;  %v2845_v20 = vpop.f32.mrb[4].mxu0  ;;  %v757_v24 = vmul.f32 %v3505_v59, %v721_v16 }
  0xee   : > { %v794_v18 = vadd.f32 %v3511_v0, %v758_v12  ;;  %vm643_vm11 = vcmp.gt.f32.partialorder %v493_v13, 0.0  ;;  %v675_v19 = vmul.f32 0.2, %v493_v13  ;;  %v2869_v21 = vpop.f32.mrb[4].mxu1  ;;  %v777_v22 = vadd.f32 %v3511_v0, %v741_v14  ;;  %v502_v26 = vpop.f32.mrb[5].mxu0 }
  0xef   : > { %v708_v23 = vsel %vm644_vm10, %v498_v5, %v676_v15  ;;  %v578_v25 = vadd.f32 %v2866_v3, %v3497_v50  ;;  %v582_v27 = vpop.f32.mrb[5].mxu1  ;;  %867 = vst.msk [vmem:[#allocation2 + $0x21] sm:$0xff] %vm809_vm4, %v778_v17  ;;  %v573_v30 = vadd.f32 %v572_v9, %v3497_v50  ;;  %v508_v31 = vadd.f32 %v2845_v20, %v3497_v50 }
  0xf0   : > { %v744_v28 = vmul.f32 %v3505_v59, %v708_v23  ;;  %883 = vst.msk [vmem:[#allocation2 + $0xe1] sm:$0xff] %vm809_vm4, %v794_v18  ;;  %v707_v29 = vsel %vm643_vm11, %v493_v13, %v675_v19  ;;  %866 = vst.msk [vmem:[#allocation2 + $0x19] sm:$0xff] %vm809_vm4, %v777_v22  ;;  %v793_v33 = vadd.f32 %v3511_v0, %v757_v24 }
  0xf1   : > { %v743_v32 = vmul.f32 %v3505_v59, %v707_v29  ;;  %vm660_vm12 = vcmp.gt.f32.partialorder %v578_v25, 0.0  ;;  %v692_v34 = vmul.f32 0.2, %v578_v25  ;;  %vm659_vm13 = vcmp.gt.f32.partialorder %v573_v30, 0.0  ;;  %v2848_v38 = vpop.f32.mrb[6].mxu0 }
  0xf2   : > { %v780_v36 = vadd.f32 %v3511_v0, %v744_v28  ;;  %v691_v37 = vmul.f32 0.2, %v573_v30  ;;  %vm646_vm14 = vcmp.gt.f32.partialorder %v508_v31, 0.0  ;;  %v2872_v40 = vpop.f32.mrb[6].mxu1  ;;  %882 = vst.msk [vmem:[#allocation2 + $0xd9] sm:$0xff] %vm809_vm4, %v793_v33  ;;  %v588_v44 = vadd.f32 %v2869_v21, %v3497_v50  ;;  %v512_v45 = vpop.f32.mrb[7].mxu0 }
  0xf3   : > { %v779_v41 = vadd.f32 %v3511_v0, %v743_v32  ;;  %v724_v42 = vsel %vm660_vm12, %v578_v25, %v692_v34  ;;  %v678_v43 = vmul.f32 0.2, %v508_v31  ;;  %v592_v46 = vpop.f32.mrb[7].mxu1  ;;  %v503_v54 = vadd.f32 %v502_v26, %v3497_v50 }
  0xf4   : > { %869 = vst.msk [vmem:[#allocation2 + $0x39] sm:$0xff] %vm809_vm4, %v780_v36  ;;  %v760_v49 = vmul.f32 %v3505_v59, %v724_v42  ;;  %v723_v52 = vsel %vm659_vm13, %v573_v30, %v691_v37  ;;  %v583_v55 = vadd.f32 %v582_v27, %v3497_v50  ;;  %vm662_vm15 = vcmp.gt.f32.partialorder %v588_v44, 0.0 }
  0xf5   : > { %868 = vst.msk [vmem:[#allocation2 + $0x31] sm:$0xff] %vm809_vm4, %v779_v41  ;;  %v759_v56 = vmul.f32 %v3505_v59, %v723_v52  ;;  %v710_v57 = vsel %vm646_vm14, %v508_v31, %v678_v43  ;;  %v694_v58 = vmul.f32 0.2, %v588_v44  ;;  %vm645_vm0 = vcmp.gt.f32.partialorder %v503_v54, 0.0  ;;  %v2851_v63 = vpop.f32.mrb[8].mxu0 }
  0xf6   : > { %v796_v60 = vadd.f32 %v3511_v0, %v760_v49  ;;  %v746_v61 = vmul.f32 %v3505_v59, %v710_v57  ;;  %v677_v62 = vmul.f32 0.2, %v503_v54  ;;  %v3544_v1 = vpop.f32.mrb[8].mxu1  ;;  %vm661_vm1 = vcmp.gt.f32.partialorder %v583_v55, 0.0  ;;  %v522_v5 = vpop.f32.mrb[9].mxu0 }
  0xf7   : > { %v795_v2 = vadd.f32 %v3511_v0, %v759_v56  ;;  %v726_v3 = vsel %vm662_vm15, %v588_v44, %v694_v58  ;;  %v693_v4 = vmul.f32 0.2, %v583_v55  ;;  %v602_v6 = vpop.f32.mrb[9].mxu1  ;;  %v518_v10 = vadd.f32 %v2848_v38, %v3497_v50 }
  0xf8   : > { %885 = vst.msk [vmem:[#allocation2 + $0xf9] sm:$0xff] %vm809_vm4, %v796_v60  ;;  %v782_v7 = vadd.f32 %v3511_v0, %v746_v61  ;;  %v762_v8 = vmul.f32 %v3505_v59, %v726_v3  ;;  %v709_v9 = vsel %vm645_vm0, %v503_v54, %v677_v62  ;;  %v598_v13 = vadd.f32 %v2872_v40, %v3497_v50 }
  0xf9   : > { %884 = vst.msk [vmem:[#allocation2 + $0xf1] sm:$0xff] %vm809_vm4, %v795_v2  ;;  %v745_v11 = vmul.f32 %v3505_v59, %v709_v9  ;;  %v725_v12 = vsel %vm661_vm1, %v583_v55, %v693_v4  ;;  %v513_v14 = vadd.f32 %v512_v45, %v3497_v50  ;;  %vm648_vm2 = vcmp.gt.f32.partialorder %v518_v10, 0.0  ;;  %v2854_v18 = vpop.f32.mrb[10].mxu0 }
  0xfa   : > { %871 = vst.msk [vmem:[#allocation2 + $0x51] sm:$0xff] %vm809_vm4, %v782_v7  ;;  %v798_v15 = vadd.f32 %v3511_v0, %v762_v8  ;;  %v761_v16 = vmul.f32 %v3505_v59, %v725_v12  ;;  %v680_v17 = vmul.f32 0.2, %v518_v10  ;;  %v3558_v19 = vpop.f32.mrb[10].mxu1  ;;  %vm664_vm3 = vcmp.gt.f32.partialorder %v598_v13, 0.0  ;;  %v532_v22 = vpop.f32.mrb[11].mxu0 }
  0xfb   : > { %v781_v20 = vadd.f32 %v3511_v0, %v745_v11  ;;  %v696_v21 = vmul.f32 0.2, %v598_v13  ;;  %vm647_vm5 = vcmp.gt.f32.partialorder %v513_v14, 0.0  ;;  %v612_v23 = vpop.f32.mrb[11].mxu1  ;;  %v679_v26 = vmul.f32 0.2, %v513_v14 }
  0xfc   : > { %887 = vst.msk [vmem:[#allocation2 + $0x111] sm:$0xff] %vm809_vm4, %v798_v15  ;;  %v797_v24 = vadd.f32 %v3511_v0, %v761_v16  ;;  %v712_v25 = vsel %vm648_vm2, %v518_v10, %v680_v17  ;;  %v593_v27 = vadd.f32 %v592_v46, %v3497_v50  ;;  %v1025_v28 = vld [vmem:[#allocation2 + $0x32] ss:$2 sm:$0xff]  ;;  %v528_v31 = vadd.f32 %v2851_v63, %v3497_v50 }
  0xfd   : > { %870 = vst.msk [vmem:[#allocation2 + $0x49] sm:$0xff] %vm809_vm4, %v781_v20  ;;  %v748_v29 = vmul.f32 %v3505_v59, %v712_v25  ;;  %v728_v30 = vsel %vm664_vm3, %v598_v13, %v696_v21  ;;  %v523_v32 = vadd.f32 %v522_v5, %v3497_v50  ;;  %2656 = vmatprep.mubr.msk.f32.mxu1 %vm809_vm4, %v1025_v28  ;;  %v3572_v37 = vpop.f32.mrb[12].mxu0 }
  0xfe   : > { %886 = vst.msk [vmem:[#allocation2 + $0x109] sm:$0xff] %vm809_vm4, %v797_v24  ;;  %v764_v33 = vmul.f32 %v3505_v59, %v728_v30  ;;  %v711_v34 = vsel %vm647_vm5, %v513_v14, %v679_v26  ;;  %vm663_vm6 = vcmp.gt.f32.partialorder %v593_v27, 0.0  ;;  %v695_v36 = vmul.f32 0.2, %v593_v27  ;;  %v3574_v38 = vpop.f32.mrb[12].mxu1  ;;  %v542_v43 = vpop.f32.mrb[13].mxu0 }
  0xff   : > { %v784_v40 = vadd.f32 %v3511_v0, %v748_v29  ;;  %v747_v41 = vmul.f32 %v3505_v59, %v711_v34  ;;  %vm650_vm7 = vcmp.gt.f32.partialorder %v528_v31, 0.0  ;;  %v682_v42 = vmul.f32 0.2, %v528_v31  ;;  %v3578_v44 = vpop.f32.mrb[13].mxu1  ;;  %v916_v34 = vld [vmem:[#allocation2 + $0x31] ss:$2 sm:$0xff] }
 0x100   : > { %v800_v45 = vadd.f32 %v3511_v0, %v764_v33  ;;  %v727_v46 = vsel %vm663_vm6, %v593_v27, %v695_v36  ;;  %vm649_vm8 = vcmp.gt.f32.partialorder %v523_v32, 0.0  ;;  %v681_v49 = vmul.f32 0.2, %v523_v32  ;;  %v914_v33 = vld [vmem:[#allocation2 + $0x1] ss:$2 sm:$0xff] }
 0x101   : > { %873 = vst.msk [vmem:[#allocation2 + $0x69] sm:$0xff] %vm809_vm4, %v784_v40  ;;  %v783_v52 = vadd.f32 %v3511_v0, %v747_v41  ;;  %v763_v54 = vmul.f32 %v3505_v59, %v727_v46  ;;  %v714_v55 = vsel %vm650_vm7, %v528_v31, %v682_v42  ;;  %v608_v56 = vadd.f32 %v3544_v1, %v3497_v50  ;;  %v3590_v62 = vpop.f32.mrb[14].mxu0  ;;  %v930_v41 = vld [vmem:[#allocation2 + $0x2] ss:$2 sm:$0xff] }
 0x102   : > { %889 = vst.msk [vmem:[#allocation2 + $0x129] sm:$0xff] %vm809_vm4, %v800_v45  ;;  %v750_v57 = vmul.f32 %v3505_v59, %v714_v55  ;;  %v713_v58 = vsel %vm649_vm8, %v523_v32, %v681_v49  ;;  %v538_v60 = vadd.f32 %v2854_v18, %v3497_v50  ;;  %v603_v61 = vadd.f32 %v602_v6, %v3497_v50  ;;  %v3592_v63 = vpop.f32.mrb[14].mxu1  ;;  %v3597_v4 = vpop.f32.mrb[15].mxu0 }
 0x103   : > { %872 = vst.msk [vmem:[#allocation2 + $0x61] sm:$0xff] %vm809_vm4, %v783_v52  ;;  %v799_v2 = vadd.f32 %v3511_v0, %v763_v54  ;;  %v749_v3 = vmul.f32 %v3505_v59, %v713_v58  ;;  %vm666_vm9 = vcmp.gt.f32.partialorder %v608_v56, 0.0  ;;  %v698_v1 = vmul.f32 0.2, %v608_v56  ;;  %v3599_v5 = vpop.f32.mrb[15].mxu1 }
 0x104   : > { %v786_v7 = vadd.f32 %v3511_v0, %v750_v57  ;;  %vm652_vm10 = vcmp.gt.f32.partialorder %v538_v60, 0.0  ;;  %v684_v6 = vmul.f32 0.2, %v538_v60  ;;  %vm665_vm11 = vcmp.gt.f32.partialorder %v603_v61, 0.0 }
 0x105   : > { %888 = vst.msk [vmem:[#allocation2 + $0x121] sm:$0xff] %vm809_vm4, %v799_v2  ;;  %v785_v8 = vadd.f32 %v3511_v0, %v749_v3  ;;  %v730_v9 = vsel %vm666_vm9, %v608_v56, %v698_v1  ;;  %v697_v10 = vmul.f32 0.2, %v603_v61  ;;  %v533_v11 = vadd.f32 %v532_v22, %v3497_v50  ;;  %v947_v3 = vld [vmem:[#allocation2 + $0x48] ss:$2 sm:$0xff] }
 0x106   : > { %875 = vst.msk [vmem:[#allocation2 + $0x81] sm:$0xff] %vm809_vm4, %v786_v7  ;;  %v766_v12 = vmul.f32 %v3505_v59, %v730_v9  ;;  %v716_v13 = vsel %vm652_vm10, %v538_v60, %v684_v6  ;;  %v618_v14 = vadd.f32 %v3558_v19, %v3497_v50  ;;  %v613_v15 = vadd.f32 %v612_v23, %v3497_v50 }
 0x107   : > { %874 = vst.msk [vmem:[#allocation2 + $0x79] sm:$0xff] %vm809_vm4, %v785_v8  ;;  %v752_v16 = vmul.f32 %v3505_v59, %v716_v13  ;;  %v729_v17 = vsel %vm665_vm11, %v603_v61, %v697_v10  ;;  %vm651_vm12 = vcmp.gt.f32.partialorder %v533_v11, 0.0  ;;  %v683_v18 = vmul.f32 0.2, %v533_v11  ;;  %v945_v8 = vld [vmem:[#allocation2 + $0x18] ss:$2 sm:$0xff] }
 0x108   : > { %v802_v20 = vadd.f32 %v3511_v0, %v766_v12  ;;  %v765_v21 = vmul.f32 %v3505_v59, %v729_v17  ;;  %vm668_vm13 = vcmp.gt.f32.partialorder %v618_v14, 0.0  ;;  %v700_v22 = vmul.f32 0.2, %v618_v14  ;;  %v979_v12 = vld [vmem:[#allocation2 + $0x4a] ss:$2 sm:$0xff] }
 0x109   : > { %v788_v24 = vadd.f32 %v3511_v0, %v752_v16  ;;  %v715_v25 = vsel %vm651_vm12, %v533_v11, %v683_v18  ;;  %vm667_vm14 = vcmp.gt.f32.partialorder %v613_v15, 0.0  ;;  %v699_v19 = vmul.f32 0.2, %v613_v15  ;;  %v977_v18 = vld [vmem:[#allocation2 + $0x1a] ss:$2 sm:$0xff] }
 0x10a   : > { %891 = vst.msk [vmem:[#allocation2 + $0x141] sm:$0xff] %vm809_vm4, %v802_v20  ;;  %v801_v23 = vadd.f32 %v3511_v0, %v765_v21  ;;  %v751_v26 = vmul.f32 %v3505_v59, %v715_v25  ;;  %v732_v27 = vsel %vm668_vm13, %v618_v14, %v700_v22  ;;  %v548_v28 = vadd.f32 %v3572_v37, %v3497_v50  ;;  %v1332_v25 = vld [vmem:[%s4345_s2 + $0x30] sm:$0xff] }
 0x10b   : > { %877 = vst.msk [vmem:[#allocation2 + $0x99] sm:$0xff] %vm809_vm4, %v788_v24  ;;  %v768_v29 = vmul.f32 %v3505_v59, %v732_v27  ;;  %v731_v30 = vsel %vm667_vm14, %v613_v15, %v699_v19  ;;  %v543_v31 = vadd.f32 %v542_v43, %v3497_v50  ;;  %v628_v32 = vadd.f32 %v3574_v38, %v3497_v50  ;;  %v932_v43 = vld [vmem:[#allocation2 + $0x32] ss:$2 sm:$0xff]  ;;  %v963_v15 = vld [vmem:[#allocation2 + $0x49] ss:$2 sm:$0xff] }
 0x10c   : > { %890 = vst.msk [vmem:[#allocation2 + $0x139] sm:$0xff] %vm809_vm4, %v801_v23  ;;  %v787_v36 = vadd.f32 %v3511_v0, %v751_v26  ;;  %v767_v40 = vmul.f32 %v3505_v59, %v731_v30  ;;  %vm654_vm15 = vcmp.gt.f32.partialorder %v548_v28, 0.0  ;;  %v686_v37 = vmul.f32 0.2, %v548_v28  ;;  %v961_v24 = vld [vmem:[#allocation2 + $0x19] ss:$2 sm:$0xff] }
 0x10d   : > { %v804_v42 = vadd.f32 %v3511_v0, %v768_v29  ;;  %vm653_vm0 = vcmp.gt.f32.partialorder %v543_v31, 0.0  ;;  %v685_v45 = vmul.f32 0.2, %v543_v31  ;;  %vm670_vm1 = vcmp.gt.f32.partialorder %v628_v32, 0.0  ;;  %v1333_v19 = vld [vmem:[%s4345_s2 + $0x38] sm:$0xff]  ;;  %v1334_v30 = vld [vmem:[%s4345_s2 + $0x40] sm:$0xff] }
 0x10e   : > { %876 = vst.msk [vmem:[#allocation2 + $0x91] sm:$0xff] %vm809_vm4, %v787_v36  ;;  %v803_v38 = vadd.f32 %v3511_v0, %v767_v40  ;;  %v718_v46 = vsel %vm654_vm15, %v548_v28, %v686_v37  ;;  %v702_v49 = vmul.f32 0.2, %v628_v32  ;;  %v3087_v52 = vpack.i.bf16 %v916_v34, %v914_v33  ;;  %v955_v27 = vld [vmem:[#allocation2 + $0x108] ss:$2 sm:$0xff] }
 0x10f   : > { %893 = vst.msk [vmem:[#allocation2 + $0x159] sm:$0xff] %vm809_vm4, %v804_v42  ;;  %v754_v54 = vmul.f32 %v3505_v59, %v718_v46  ;;  %v717_v55 = vsel %vm653_vm0, %v543_v31, %v685_v45  ;;  %v623_v56 = vadd.f32 %v3578_v44, %v3497_v50  ;;  %v558_v57 = vadd.f32 %v3590_v62, %v3497_v50  ;;  %v971_v29 = vld [vmem:[#allocation2 + $0x109] ss:$2 sm:$0xff]  ;;  %v969_v37 = vld [vmem:[#allocation2 + $0xd9] ss:$2 sm:$0xff] }
 0x110   : > { %892 = vst.msk [vmem:[#allocation2 + $0x151] sm:$0xff] %vm809_vm4, %v803_v38  ;;  %v753_v58 = vmul.f32 %v3505_v59, %v717_v55  ;;  %v734_v60 = vsel %vm670_vm1, %v628_v32, %v702_v49  ;;  %3088 = vrot.lane.b32.xlu0 %v3087_v52, %s3229_s27  ;;  %v553_v61 = vadd.f32 %v3597_v4, %v3497_v50  ;;  %v1335_v31 = vld [vmem:[%s4345_s2 + $0x48] sm:$0xff]  ;;  %v953_v32 = vld [vmem:[#allocation2 + $0xd8] ss:$2 sm:$0xff]  ;;  %vm1272_vm6 = vcmask 261120  }
 0x111   : > { %v3092_v2 = vpack.i.bf16 %v932_v43, %v930_v41  ;;  %v790_v1 = vadd.f32 %v3511_v0, %v754_v54  ;;  %v770_v44 = vmul.f32 %v3505_v59, %v734_v60  ;;  %vm669_vm2 = vcmp.gt.f32.partialorder %v623_v56, 0.0  ;;  %v985_v42 = vld [vmem:[#allocation2 + $0xda] ss:$2 sm:$0xff]  ;;  %v987_v45 = vld [vmem:[#allocation2 + $0x10a] ss:$2 sm:$0xff]  ;;  %1525 = vst.msk [vmem:[#allocation3] sm:$0xff] %vm1272_vm6, %v3227_v35 }
 0x112   : > { %v701_v7 = vmul.f32 0.2, %v623_v56  ;;  %v789_v62 = vadd.f32 %v3511_v0, %v753_v58  ;;  %vm656_vm3 = vcmp.gt.f32.partialorder %v558_v57, 0.0  ;;  %v688_v6 = vmul.f32 0.2, %v558_v57  ;;  %1528 = vst.msk [vmem:[#allocation3 + $0x10] sm:$0xff] %vm1272_vm6, %v3227_v35 }
 0x113   : > { %vm655_vm5 = vcmp.gt.f32.partialorder %v553_v61, 0.0  ;;  %879 = vst.msk [vmem:[#allocation2 + $0xb1] sm:$0xff] %vm809_vm4, %v790_v1  ;;  %v806_v9 = vadd.f32 %v3511_v0, %v770_v44  ;;  %v687_v4 = vmul.f32 0.2, %v553_v61  ;;  %v3097_v11 = vpack.i.bf16 %v947_v3, %v945_v8  ;;  %v1337_v43 = vld [vmem:[%s4345_s2 + $0x58] sm:$0xff]  ;;  %v1338_v3 = vld [vmem:[%s4345_s2 + $0x60] sm:$0xff] }
 0x114   : > { %v733_v10 = vsel %vm669_vm2, %v623_v56, %v701_v7  ;;  %878 = vst.msk [vmem:[#allocation2 + $0xa9] sm:$0xff] %vm809_vm4, %v789_v62  ;;  %v720_v14 = vsel %vm656_vm3, %v558_v57, %v688_v6  ;;  %3093 = vrot.lane.b32.xlu0 %v3092_v2, %s3230_s28  ;;  %v3107_v22 = vpack.i.bf16 %v979_v12, %v977_v18  ;;  %v993_v52 = vld [vmem:[#allocation2 + $0x30] ss:$2 sm:$0xff]  ;;  %v1011_v55 = vld [vmem:[#allocation2 + $0x61] ss:$2 sm:$0xff]  ;;  %vm1281_vm9 = vcmask 392192  }
 0x115   : > { %v769_v13 = vmul.f32 %v3505_v59, %v733_v10  ;;  %895 = vst.msk [vmem:[#allocation2 + $0x171] sm:$0xff] %vm809_vm4, %v806_v9  ;;  %v756_v16 = vmul.f32 %v3505_v59, %v720_v14  ;;  %v719_v17 = vsel %vm655_vm5, %v553_v61, %v687_v4  ;;  %3098 = vrot.lane.b32.xlu1 %v3097_v11, %s3231_s29  ;;  %v1003_v60 = vld [vmem:[#allocation2 + $0x120] ss:$2 sm:$0xff]  ;;  %v1009_v44 = vld [vmem:[#allocation2 + $0x31] ss:$2 sm:$0xff]  ;;  %vm1290_vm10 = vcmask 523264  }
 0x116   : > { %v755_v21 = vmul.f32 %v3505_v59, %v719_v17  ;;  %v3102_v26 = vpack.i.bf16 %v963_v15, %v961_v24  ;;  %v638_v33 = vadd.f32 %v3592_v63, %v3497_v50  ;;  %v633_v34 = vadd.f32 %v3599_v5, %v3497_v50  ;;  %1530 = vst.msk [vmem:[#allocation3 + $0x20] sm:$0xff] %vm1272_vm6, %v3227_v35  ;;  %v995_v63 = vld [vmem:[#allocation2 + $0x60] ss:$2 sm:$0xff]  ;;  %v1336_v5 = vld [vmem:[%s4345_s2 + $0x50] sm:$0xff]  ;;  %v1341_v12 = vld [vmem:[%s4345_s2 + $0x78] sm:$0xff] }
 0x117   : > { %v805_v20 = vadd.f32 %v3511_v0, %v769_v13  ;;  %v792_v23 = vadd.f32 %v3511_v0, %v756_v16  ;;  %v2931_v36 = vpack.c.bf16 %v1333_v19, %v1332_v25  ;;  %v3112_v40 = vpack.i.bf16 %v955_v27, %v953_v32  ;;  %1532 = vst.msk [vmem:[#allocation3 + $0x30] sm:$0xff] %vm1272_vm6, %v3227_v35  ;;  %v1339_v1 = vld [vmem:[%s4345_s2 + $0x68] sm:$0xff]  ;;  %v1001_v62 = vld [vmem:[#allocation2 + $0xf0] ss:$2 sm:$0xff]  ;;  %v920_v4 = vld [vmem:[#allocation2 + $0x91] ss:$2 sm:$0xff] }
 0x118   : > { %v791_v28 = vadd.f32 %v3511_v0, %v755_v21  ;;  %3108 = vrot.lane.b32.xlu0 %v3107_v22, %s3232_s11  ;;  %v3117_v41 = vpack.i.bf16 %v971_v29, %v969_v37  ;;  %1534 = vst.msk [vmem:[#allocation3 + $0x40] sm:$0xff] %vm1272_vm6, %v3227_v35  ;;  %1536 = vst.msk [vmem:[#allocation3 + $0x50] sm:$0xff] %vm1272_vm6, %v3227_v35  ;;  %v2934_v50 = vpack.c.bf16 %v1335_v31, %v1334_v30  ;;  %v1340_v11 = vld [vmem:[%s4345_s2 + $0x70] sm:$0xff]  ;;  %v918_v14 = vld [vmem:[#allocation2 + $0x61] ss:$2 sm:$0xff]  ;;  %vm1299_vm11 = vcmask 654336  }
 0x119   : > { %894 = vst.msk [vmem:[#allocation2 + $0x169] sm:$0xff] %vm809_vm4, %v805_v20  ;;  %881 = vst.msk [vmem:[#allocation2 + $0xc9] sm:$0xff] %vm809_vm4, %v792_v23  ;;  %3103 = vrot.lane.b32.xlu1 %v3102_v26, %s3233_s16  ;;  %2932 = vmatpush1.bf16.msra.mxu1 %v2931_v36  ;;  %vm672_vm7 = vcmp.gt.f32.partialorder %v638_v33, 0.0  ;;  %v704_v38 = vmul.f32 0.2, %v638_v33  ;;  %vm671_vm8 = vcmp.gt.f32.partialorder %v633_v34, 0.0  ;;  %v3122_v49 = vpack.i.bf16 %v987_v45, %v985_v42 }
 0x11a   : > { %880 = vst.msk [vmem:[#allocation2 + $0xc1] sm:$0xff] %vm809_vm4, %v791_v28  ;;  %2933 = vmatprep.subr.bf16.mxu1 %v3228_v39  ;;  %v703_v46 = vmul.f32 0.2, %v633_v34  ;;  %v3127_v54 = vpack.i.bf16 %v995_v63, %v993_v52  ;;  %v2937_v58 = vpack.c.bf16 %v1337_v43, %v1336_v5  ;;  %v3132_v7 = vpack.i.bf16 %v1011_v55, %v1009_v44  ;;  %v936_v16 = vld [vmem:[#allocation2 + $0x92] ss:$2 sm:$0xff]  ;;  %v1343_v22 = vld [vmem:[%s4345_s2 + $0x88] sm:$0xff] }
 0x11b   : > { %1538 = vst.msk [vmem:[#allocation3 + $0x60] sm:$0xff] %vm1272_vm6, %v3227_v35  ;;  %1540 = vst.msk [vmem:[#allocation3 + $0x70] sm:$0xff] %vm1272_vm6, %v3227_v35  ;;  %v736_v56 = vsel %vm672_vm7, %v638_v33, %v704_v38  ;;  %v3137_v8 = vpack.i.bf16 %v1003_v60, %v1001_v62  ;;  %v2940_v10 = vpack.c.bf16 %v1339_v1, %v1338_v3  ;;  %v926_v17 = vld [vmem:[#allocation2 + $0x121] ss:$2 sm:$0xff]  ;;  %v928_v20 = vld [vmem:[#allocation2 + $0x151] ss:$2 sm:$0xff] }
 0x11c   : > { %1542 = vst.msk [vmem:[#allocation3 + $0x80] sm:$0xff] %vm1272_vm6, %v3227_v35  ;;  %3113 = vrot.lane.b32.xlu0 %v3112_v40, %s3231_s29  ;;  %v735_v57 = vsel %vm671_vm8, %v633_v34, %v703_v46  ;;  %v772_v61 = vmul.f32 %v3505_v59, %v736_v56  ;;  %v3147_v15 = vpack.i.bf16 %v920_v4, %v918_v14  ;;  %v1342_v21 = vld [vmem:[%s4345_s2 + $0x80] sm:$0xff]  ;;  %v967_v23 = vld [vmem:[#allocation2 + $0xa9] ss:$2 sm:$0xff]  ;;  %v951_v27 = vld [vmem:[#allocation2 + $0xa8] ss:$2 sm:$0xff] }
 0x11d   : > { %3118 = vrot.lane.b32.xlu1 %v3117_v41, %s3233_s16  ;;  %2935 = vmatpush1.bf16.msra.mxu1 %v2934_v50  ;;  %v771_v2 = vmul.f32 %v3505_v59, %v735_v57  ;;  %v1019_v59 = vld [vmem:[#allocation2 + $0x121] ss:$2 sm:$0xff]  ;;  %v2943_v18 = vpack.c.bf16 %v1341_v12, %v1340_v11  ;;  %v934_v24 = vld [vmem:[#allocation2 + $0x62] ss:$2 sm:$0xff]  ;;  %v3157_v19 = vpack.i.bf16 %v928_v20, %v926_v17  ;;  %v924_v45 = vld [vmem:[#allocation2 + $0xf1] ss:$2 sm:$0xff] }
 0x11e   : > { %2936 = vmatprep.subr.bf16.mxu1 %v3228_v39  ;;  %v808_v6 = vadd.f32 %v3511_v0, %v772_v61  ;;  %v3152_v25 = vpack.i.bf16 %v936_v16, %v934_v24  ;;  %v2946_v26 = vpack.c.bf16 %v1343_v22, %v1342_v21  ;;  %v965_v28 = vld [vmem:[#allocation2 + $0x79] ss:$2 sm:$0xff]  ;;  %v949_v30 = vld [vmem:[#allocation2 + $0x78] ss:$2 sm:$0xff]  ;;  %vm1308_vm12 = vcmask 785408  }
 0x11f   : > { %v807_v9 = vadd.f32 %v3511_v0, %v771_v2  ;;  %v1017_v0 = vld [vmem:[#allocation2 + $0xf1] ss:$2 sm:$0xff]  ;;  %v3167_v29 = vpack.i.bf16 %v967_v23, %v965_v28  ;;  %v3162_v31 = vpack.i.bf16 %v951_v27, %v949_v30  ;;  %v983_v33 = vld [vmem:[#allocation2 + $0xaa] ss:$2 sm:$0xff]  ;;  %v981_v40 = vld [vmem:[#allocation2 + $0x7a] ss:$2 sm:$0xff] }
 0x120   : > { %3123 = vrot.lane.b32.xlu0 %v3122_v49, %s3232_s11  ;;  %897 = vst.msk [vmem:[#allocation2 + $0x189] sm:$0xff] %vm809_vm4, %v808_v6  ;;  %v3142_v13 = vpack.i.bf16 %v1019_v59, %v1017_v0  ;;  %v997_v34 = vld [vmem:[#allocation2 + $0x90] ss:$2 sm:$0xff]  ;;  %v3172_v37 = vpack.i.bf16 %v983_v33, %v981_v40  ;;  %v1013_v63 = vld [vmem:[#allocation2 + $0x91] ss:$2 sm:$0xff]  ;;  %vm1317_vm13 = vcmask 916480  }
 0x121   : > { %3128 = vrot.lane.b32.xlu1 %v3127_v54, %s3234_s30  ;;  %2938 = vmatpush1.bf16.msra.mxu1 %v2937_v58  ;;  %896 = vst.msk [vmem:[#allocation2 + $0x181] sm:$0xff] %vm809_vm4, %v807_v9  ;;  %v999_v32 = vld [vmem:[#allocation2 + $0xc0] ss:$2 sm:$0xff]  ;;  %v922_v41 = vld [vmem:[#allocation2 + $0xc1] ss:$2 sm:$0xff]  ;;  %vm1526_vm14 = vcmask 254976  }
 0x122   : > { %2939 = vmatprep.subr.bf16.mxu1 %v3228_v39  ;;  %v3177_v36 = vpack.i.bf16 %v999_v32, %v997_v34  ;;  %v1015_v42 = vld [vmem:[#allocation2 + $0xc1] ss:$2 sm:$0xff]  ;;  %v3187_v50 = vpack.i.bf16 %v924_v45, %v922_v41  ;;  %v942_v43 = vld [vmem:[#allocation2 + $0x122] ss:$2 sm:$0xff]  ;;  %v944_v38 = vld [vmem:[#allocation2 + $0x152] ss:$2 sm:$0xff] }
 0x123   : > { %v3182_v5 = vpack.i.bf16 %v1015_v42, %v1013_v63  ;;  %v938_v46 = vld [vmem:[#allocation2 + $0xc2] ss:$2 sm:$0xff]  ;;  %v3192_v49 = vpack.i.bf16 %v944_v38, %v942_v43  ;;  %v940_v52 = vld [vmem:[#allocation2 + $0xf2] ss:$2 sm:$0xff]  ;;  %v973_v55 = vld [vmem:[#allocation2 + $0x139] ss:$2 sm:$0xff] }
 0x124   : > { %3133 = vrot.lane.b32.xlu0 %v3132_v7, %s3235_s8  ;;  %v3197_v54 = vpack.i.bf16 %v940_v52, %v938_v46  ;;  %v975_v56 = vld [vmem:[#allocation2 + $0x169] ss:$2 sm:$0xff]  ;;  %v957_v57 = vld [vmem:[#allocation2 + $0x138] ss:$2 sm:$0xff]  ;;  %v959_v58 = vld [vmem:[#allocation2 + $0x168] ss:$2 sm:$0xff] }
 0x125   : > { %3138 = vrot.lane.b32.xlu1 %v3137_v8, %s3234_s30  ;;  %2941 = vmatpush1.bf16.msra.mxu1 %v2940_v10  ;;  %v3207_v60 = vpack.i.bf16 %v975_v56, %v973_v55  ;;  %v3202_v61 = vpack.i.bf16 %v959_v58, %v957_v57  ;;  %v1005_v2 = vld [vmem:[#allocation2 + $0x150] ss:$2 sm:$0xff]  ;;  %v1021_v44 = vld [vmem:[#allocation2 + $0x151] ss:$2 sm:$0xff]  ;;  %v898_v11 = vld [vmem:[#allocation2] ss:$2 sm:$0xff] }
 0x126   : > { %2942 = vmatprep.subr.bf16.mxu1 %v3228_v39  ;;  %v989_v3 = vld [vmem:[#allocation2 + $0x13a] ss:$2 sm:$0xff]  ;;  %v991_v1 = vld [vmem:[#allocation2 + $0x16a] ss:$2 sm:$0xff]  ;;  %1529 = vst.msk [vmem:[#allocation3 + $0x18] sm:$0x3] %vm1526_vm14, %v3227_v35 }
 0x127   : > { %v900_v21 = vld [vmem:[#allocation2 + $0x30] ss:$2 sm:$0xff]  ;;  %1527 = vst.msk [vmem:[#allocation3 + $0x8] sm:$0x3] %vm1526_vm14, %v3227_v35  ;;  %1531 = vst.msk [vmem:[#allocation3 + $0x28] sm:$0x3] %vm1526_vm14, %v3227_v35 }
 0x128   : > { %3143 = vrot.lane.b32.xlu0 %v3142_v13, %s3235_s8  ;;  %v1023_v7 = vld [vmem:[#allocation2 + $0x181] ss:$2 sm:$0xff]  ;;  %v1007_v62 = vld [vmem:[#allocation2 + $0x180] ss:$2 sm:$0xff]  ;;  %1533 = vst.msk [vmem:[#allocation3 + $0x38] sm:$0x3] %vm1526_vm14, %v3227_v35 }
 0x129   : > { %3148 = vrot.lane.b32.xlu1 %v3147_v15, %s3229_s27  ;;  %2944 = vmatpush1.bf16.msra.mxu1 %v2943_v18  ;;  %1535 = vst.msk [vmem:[#allocation3 + $0x48] sm:$0x3] %vm1526_vm14, %v3227_v35  ;;  %1537 = vst.msk [vmem:[#allocation3 + $0x58] sm:$0x3] %vm1526_vm14, %v3227_v35  ;;  %vm1983_vm8 = vcmask 521216  }
 0x12a   : > { %2945 = vmatprep.subr.bf16.mxu1 %v3228_v39  ;;  %1539 = vst.msk [vmem:[#allocation3 + $0x68] sm:$0x3] %vm1526_vm14, %v3227_v35  ;;  %1541 = vst.msk [vmem:[#allocation3 + $0x78] sm:$0x3] %vm1526_vm14, %v3227_v35 }
 0x12b   : > { %1543 = vst.msk [vmem:[#allocation3 + $0x88] sm:$0x3] %vm1526_vm14, %v3227_v35 }
 0x12c   : > { %3153 = vrot.lane.b32.xlu0 %v3152_v25, %s3230_s28  ;;  %1984 = vst.msk [vmem:[#allocation4] sm:$0x3f] %vm1983_vm8, %v3227_v35  ;;  %1987 = vst.msk [vmem:[#allocation4 + $0x18] sm:$0x3f] %vm1983_vm8, %v3227_v35 }
 0x12d   : > { %3158 = vrot.lane.b32.xlu1 %v3157_v19, %s3229_s27  ;;  %2947 = vmatpush1.bf16.msra.mxu1 %v2946_v26  ;;  %1988 = vst.msk [vmem:[#allocation4 + $0x20] sm:$0x3f] %vm1983_vm8, %v3227_v35  ;;  %1985 = vst.msk [vmem:[#allocation4 + $0x8] sm:$0x3f] %vm1983_vm8, %v3227_v35 }
 0x12e   : > { %1986 = vst.msk [vmem:[#allocation4 + $0x10] sm:$0x3f] %vm1983_vm8, %v3227_v35 }
 0x130   : > { %3168 = vrot.lane.b32.xlu0 %v3167_v29, %s3233_s16 }
 0x131   : > { %3163 = vrot.lane.b32.xlu1 %v3162_v31, %s3231_s29 }
 0x134   : > { %3178 = vrot.lane.b32.xlu0 %v3177_v36, %s3234_s30 }
 0x135   : > { %3173 = vrot.lane.b32.xlu1 %v3172_v37, %s3232_s11 }
 0x138   : > { %3188 = vrot.lane.b32.xlu0 %v3187_v50, %s3229_s27 }
 0x139   : > { %3183 = vrot.lane.b32.xlu1 %v3182_v5, %s3235_s8  ;;  %v1027_v5 = vld [vmem:[#allocation2 + $0x62] ss:$2 sm:$0xff] }
 0x13c   : > { %3193 = vrot.lane.b32.xlu0 %v3192_v49, %s3230_s28 }
 0x13d   : > { %3198 = vrot.lane.b32.xlu1 %v3197_v54, %s3230_s28  ;;  %v1029_v54 = vld [vmem:[#allocation2 + $0x92] ss:$2 sm:$0xff] }
 0x140   : > { %3208 = vrot.lane.b32.xlu0 %v3207_v60, %s3233_s16  ;;  %v902_v60 = vld [vmem:[#allocation2 + $0x60] ss:$2 sm:$0xff] }
 0x141   : > { %3203 = vrot.lane.b32.xlu1 %v3202_v61, %s3231_s29 }
 0x144   : > { %1220 = vrot.lane.b32.xlu0 %v1005_v2, %s3234_s30 }
 0x145   : > { %1188 = vrot.lane.b32.xlu1 %v989_v3, %s3232_s11 }
 0x148   : > { %1190 = vrot.lane.b32.xlu0 %v991_v1, %s3232_s11 }
 0x149   : > { %1252 = vrot.lane.b32.xlu1 %v1021_v44, %s3235_s8 }
 0x14c   : > { %1254 = vrot.lane.b32.xlu0 %v1023_v7, %s3235_s8  ;;  %s274_s8 = scalar_lea.vmem %s4350_s7, %s4352_s25 }
 0x14d   : > { %1222 = vrot.lane.b32.xlu1 %v1007_v62, %s3234_s30 }
 0x182   : > { %v3089_v6 = vpop.permute.xlu0 %3088 }
 0x183   : > { %v3090_v10 = vunpack.i.l.bf16 %v3089_v6  ;;  %v3091_v13 = vunpack.i.h.bf16 %v3089_v6 }
 0x185   : > { %v1264_v14 = vsel %vm809_vm4, %v898_v11, %v3090_v10  ;;  %v1265_v24 = vsel %vm809_vm4, %v900_v21, %v3091_v13 }
 0x186   : > { %v3094_v8 = vpop.permute.xlu0 %3093 }
 0x187   : > { %v3099_v59 = vpop.permute.xlu1 %3098  ;;  %v3095_v12 = vunpack.i.l.bf16 %v3094_v8  ;;  %v3096_v17 = vunpack.i.h.bf16 %v3094_v8 }
 0x188   : > { %v3100_v15 = vunpack.i.l.bf16 %v3099_v59  ;;  %v3101_v25 = vunpack.i.h.bf16 %v3099_v59 }
 0x189   : > { %v1273_v18 = vsel %vm1272_vm6, %v1264_v14, %v3095_v12  ;;  %v1274_v27 = vsel %vm1272_vm6, %v1265_v24, %v3096_v17 }
 0x18a   : > { %v3109_v9 = vpop.permute.xlu0 %3108  ;;  %v1282_v19 = vsel %vm1281_vm9, %v1273_v18, %v3100_v15  ;;  %v1283_v32 = vsel %vm1281_vm9, %v1274_v27, %v3101_v25 }
 0x18b   : > { %v3104_v4 = vpop.permute.xlu1 %3103  ;;  %v3110_v23 = vunpack.i.l.bf16 %v3109_v9  ;;  %v3111_v33 = vunpack.i.h.bf16 %v3109_v9  ;;  %v904_v9 = vld [vmem:[#allocation2 + $0x90] ss:$2 sm:$0xff] }
 0x18c   : > { %v3105_v20 = vunpack.i.l.bf16 %v3104_v4  ;;  %v3106_v28 = vunpack.i.h.bf16 %v3104_v4 }
 0x18e   : > { %v3758_v0 = vpop.permute.xlu0 %3113  ;;  %v1291_v29 = vsel %vm1290_vm10, %v1282_v19, %v3105_v20  ;;  %v1292_v37 = vsel %vm1290_vm10, %v1283_v32, %v3106_v28 }
 0x18f   : > { %v3761_v16 = vpop.permute.xlu1 %3118  ;;  %v1300_v34 = vsel %vm1299_vm11, %v1291_v29, %v3110_v23  ;;  %v1301_v38 = vsel %vm1299_vm11, %v1292_v37, %v3111_v33  ;;  %v3116_v29 = vunpack.i.h.bf16 %v3758_v0 }
 0x190   : > { %v3120_v37 = vunpack.i.l.bf16 %v3761_v16 }
 0x192   : > { %v3764_v22 = vpop.permute.xlu0 %3123 }
 0x193   : > { %v3129_v26 = vpop.permute.xlu1 %3128 }
 0x194   : > { %v3130_v30 = vunpack.i.l.bf16 %v3129_v26  ;;  %v3131_v41 = vunpack.i.h.bf16 %v3129_v26 }
 0x196   : > { %v3134_v31 = vpop.permute.xlu0 %3133  ;;  %v1309_v42 = vsel %vm1308_vm12, %v1300_v34, %v3130_v30  ;;  %v1310_v46 = vsel %vm1308_vm12, %v1301_v38, %v3131_v41  ;;  %v3115_v34 = vunpack.i.l.bf16 %v3758_v0  ;;  %v908_v38 = vld [vmem:[#allocation2 + $0xf0] ss:$2 sm:$0xff] }
 0x197   : > { %v3135_v36 = vunpack.i.l.bf16 %v3134_v31  ;;  %v3772_v40 = vpop.permute.xlu1 %3138  ;;  %v3136_v45 = vunpack.i.h.bf16 %v3134_v31 }
 0x199   : > { %v1318_v50 = vsel %vm1317_vm13, %v1309_v42, %v3135_v36  ;;  %v1319_v49 = vsel %vm1317_vm13, %v1310_v46, %v3136_v45  ;;  %v3121_v36 = vunpack.i.h.bf16 %v3761_v16  ;;  %v1031_v45 = vld [vmem:[#allocation2 + $0xc2] ss:$2 sm:$0xff] }
 0x19a   : > { %v3777_v63 = vpop.permute.xlu0 %3143  ;;  %1437 = vmatmul.mubr.f32.vlgmr.msra.gmra.mrb[16].mxu1 %v1318_v50  ;;  %v3126_v50 = vunpack.i.h.bf16 %v3764_v22 }
 0x19b   : > { %v3149_v43 = vpop.permute.xlu1 %3148  ;;  %2657 = vmatprep.mubr.msk.f32.mxu1 %vm809_vm4, %v1027_v5  ;;  %v3125_v5 = vunpack.i.l.bf16 %v3764_v22 }
 0x19c   : > { %v3150_v56 = vunpack.i.l.bf16 %v3149_v43  ;;  %v3151_v2 = vunpack.i.h.bf16 %v3149_v43  ;;  %v906_v43 = vld [vmem:[#allocation2 + $0xc0] ss:$2 sm:$0xff] }
 0x19e   : > { %v3154_v52 = vpop.permute.xlu0 %3153  ;;  %1442 = vmatmul.mubr.f32.gmra.mrb[18].mxu1 %v1319_v49  ;;  %v1266_v3 = vsel %vm809_vm4, %v902_v60, %v3150_v56  ;;  %v1267_v4 = vsel %vm809_vm4, %v904_v9, %v3151_v2  ;;  %v3140_v56 = vunpack.i.l.bf16 %v3772_v40  ;;  %v3145_v2 = vunpack.i.l.bf16 %v3777_v63 }
 0x19f   : > { %v3783_v55 = vpop.permute.xlu1 %3158  ;;  %2658 = vmatprep.mubr.msk.f32.mxu1 %vm809_vm4, %v1029_v54  ;;  %v3155_v57 = vunpack.i.l.bf16 %v3154_v52  ;;  %v3156_v44 = vunpack.i.h.bf16 %v3154_v52 }
 0x1a0   : > { %v3160_v41 = vunpack.i.l.bf16 %v3783_v55 }
 0x1a1   : > { %v1275_v7 = vsel %vm1272_vm6, %v1266_v3, %v3155_v57  ;;  %v1276_v12 = vsel %vm1272_vm6, %v1267_v4, %v3156_v44  ;;  %v910_v57 = vld [vmem:[#allocation2 + $0x120] ss:$2 sm:$0xff] }
 0x1a2   : > { %v3169_v58 = vpop.permute.xlu0 %3168  ;;  %v1270_v3 = vsel %vm809_vm4, %v910_v57, %v3160_v41 }
 0x1a3   : > { %v3164_v61 = vpop.permute.xlu1 %3163  ;;  %v3170_v62 = vunpack.i.l.bf16 %v3169_v58  ;;  %v3171_v13 = vunpack.i.h.bf16 %v3169_v58 }
 0x1a4   : > { %v3165_v1 = vunpack.i.l.bf16 %v3164_v61  ;;  %v3166_v6 = vunpack.i.h.bf16 %v3164_v61 }
 0x1a6   : > { %v1284_v8 = vsel %vm1281_vm9, %v1275_v7, %v3165_v1  ;;  %v3179_v59 = vpop.permute.xlu0 %3178  ;;  %v1285_v17 = vsel %vm1281_vm9, %v1276_v12, %v3166_v6 }
 0x1a7   : > { %v3174_v10 = vpop.permute.xlu1 %3173  ;;  %v3180_v14 = vunpack.i.l.bf16 %v3179_v59  ;;  %v1293_v15 = vsel %vm1290_vm10, %v1284_v8, %v3170_v62  ;;  %v3181_v25 = vunpack.i.h.bf16 %v3179_v59  ;;  %v1294_v28 = vsel %vm1290_vm10, %v1285_v17, %v3171_v13  ;;  %v1033_v62 = vld [vmem:[#allocation2 + $0xf2] ss:$2 sm:$0xff] }
 0x1a8   : > { %v3175_v11 = vunpack.i.l.bf16 %v3174_v10  ;;  %v3176_v18 = vunpack.i.h.bf16 %v3174_v10  ;;  %v3161_v10 = vunpack.i.h.bf16 %v3783_v55  ;;  %v3141_v13 = vunpack.i.h.bf16 %v3772_v40 }
 0x1aa   : > { %v3189_v20 = vpop.permute.xlu0 %3188  ;;  %v1302_v21 = vsel %vm1299_vm11, %v1293_v15, %v3175_v11  ;;  %v1303_v33 = vsel %vm1299_vm11, %v1294_v28, %v3176_v18 }
 0x1ab   : > { %v3184_v24 = vpop.permute.xlu1 %3183  ;;  %v3191_v23 = vunpack.i.h.bf16 %v3189_v20  ;;  %v3190_v26 = vunpack.i.l.bf16 %v3189_v20  ;;  %v1311_v27 = vsel %vm1308_vm12, %v1302_v21, %v3180_v14  ;;  %v1312_v54 = vsel %vm1308_vm12, %v1303_v33, %v3181_v25  ;;  %v912_v25 = vld [vmem:[#allocation2 + $0x150] ss:$2 sm:$0xff] }
 0x1ac   : > { %v3185_v19 = vunpack.i.l.bf16 %v3184_v24  ;;  %v3186_v30 = vunpack.i.h.bf16 %v3184_v24  ;;  %v1271_v40 = vsel %vm809_vm4, %v912_v25, %v3161_v10  ;;  %v1761_v10 = vld [vmem:[%s4346_s3] sm:$0xff] }
 0x1ad   : > { %v1269_v0 = vsel %vm809_vm4, %v908_v38, %v3191_v23  ;;  %v1268_v52 = vsel %vm809_vm4, %v906_v43, %v3190_v26  ;;  %v3146_v26 = vunpack.i.h.bf16 %v3777_v63  ;;  %v1563_v38 = vld [vmem:[#allocation3 + $0x1] ss:$2 sm:$0xf] }
 0x1ae   : > { %v3194_v31 = vpop.permute.xlu0 %3193  ;;  %v1320_v32 = vsel %vm1317_vm13, %v1311_v27, %v3185_v19  ;;  %v1321_v61 = vsel %vm1317_vm13, %v1312_v54, %v3186_v30  ;;  %v1035_v19 = vld [vmem:[#allocation2 + $0x122] ss:$2 sm:$0xff]  ;;  %1629 = vrot.lane.b32.xlu1 %v1563_v38, %s3230_s28 }
 0x1af   : > { %v3199_v42 = vpop.permute.xlu1 %3198  ;;  %1447 = vmatmul.mubr.f32.gmra.mrb[20].mxu1 %v1320_v32  ;;  %v3195_v16 = vunpack.i.l.bf16 %v3194_v31  ;;  %v3196_v14 = vunpack.i.h.bf16 %v3194_v31 }
 0x1b0   : > { %v3201_v46 = vunpack.i.h.bf16 %v3199_v42  ;;  %v3200_v49 = vunpack.i.l.bf16 %v3199_v42  ;;  %2659 = vmatprep.mubr.msk.f32.mxu1 %vm809_vm4, %v1031_v45 }
 0x1b1   : > { %v1279_v4 = vsel %vm1272_vm6, %v1270_v3, %v3195_v16  ;;  %v1280_v27 = vsel %vm1272_vm6, %v1271_v40, %v3196_v14  ;;  %v1503_v16 = vsub.s32 4, %v3489_v47  ;;  %v1765_v40 = vld [vmem:[%s4346_s3 + $0x20] sm:$0xff] }
 0x1b2   : > { %v1278_v58 = vsel %vm1272_vm6, %v1269_v0, %v3201_v46  ;;  %v1277_v22 = vsel %vm1272_vm6, %v1268_v52, %v3200_v49  ;;  %v3209_v60 = vpop.permute.xlu0 %3208  ;;  %v1571_v46 = vld [vmem:[#allocation3 + $0x2] ss:$2 sm:$0xf]  ;;  %v1346_v49 = vsub.s32 3, %v3489_v47  ;;  %v3860_v0 = vld [vmem:[%s4349_s6] sm:$0xff] }
 0x1b3   : > { %v1287_v1 = vsel %vm1281_vm9, %v1278_v58, %v3116_v29  ;;  %v1286_v44 = vsel %vm1281_vm9, %v1277_v22, %v3115_v34  ;;  %v3204_v7 = vpop.permute.xlu1 %3203  ;;  %1452 = vmatmul.mubr.f32.gmra.mrb[22].mxu1 %v1321_v61  ;;  %v3210_v6 = vunpack.i.l.bf16 %v3209_v60  ;;  %v3211_v28 = vunpack.i.h.bf16 %v3209_v60  ;;  %v1037_v34 = vld [vmem:[#allocation2 + $0x152] ss:$2 sm:$0xff]  ;;  %1645 = vrot.lane.b32.xlu1 %v1571_v46, %s3233_s16 }
 0x1b4   : > { %v3205_v8 = vunpack.i.l.bf16 %v3204_v7  ;;  %2660 = vmatprep.mubr.msk.f32.mxu1 %vm809_vm4, %v1033_v62  ;;  %v1295_v59 = vsel %vm1290_vm10, %v1286_v44, %v3120_v37  ;;  %v1296_v9 = vsel %vm1290_vm10, %v1287_v1, %v3121_v36  ;;  %v3206_v20 = vunpack.i.h.bf16 %v3204_v7 }
 0x1b5   : > { %v1304_v11 = vsel %vm1299_vm11, %v1295_v59, %v3125_v5  ;;  %v1305_v12 = vsel %vm1299_vm11, %v1296_v9, %v3126_v50  ;;  %v1039_v5 = vld [vmem:[#allocation2 + $0x182] ss:$2 sm:$0xff]  ;;  %v3865_v52 = vrot.slane %v3860_v0, %v1346_v49  ;;  %v3871_v22 = vrot.slane %v3860_v0, %v1503_v16 }
 0x1b6   : > { %v1221_v15 = vpop.permute.xlu0 %1220  ;;  %v1288_v17 = vsel %vm1281_vm9, %v1279_v4, %v3205_v8  ;;  %v1313_v18 = vsel %vm1308_vm12, %v1304_v11, %v3140_v56  ;;  %v1314_v23 = vsel %vm1308_vm12, %v1305_v12, %v3141_v13  ;;  %v1289_v31 = vsel %vm1281_vm9, %v1280_v27, %v3206_v20  ;;  %v1777_v59 = vld [vmem:[%s4346_s3 + $0x80] sm:$0xff]  ;;  %v1778_v9 = vld [vmem:[%s4346_s3 + $0x88] sm:$0xff] }
 0x1b7   : > { %v1189_v21 = vpop.permute.xlu1 %1188  ;;  %v1322_v24 = vsel %vm1317_vm13, %v1313_v18, %v3145_v2  ;;  %v1297_v55 = vsel %vm1290_vm10, %v1288_v17, %v3210_v6  ;;  %v1323_v33 = vsel %vm1317_vm13, %v1314_v23, %v3146_v26  ;;  %v1298_v63 = vsel %vm1290_vm10, %v1289_v31, %v3211_v28  ;;  %v1762_v12 = vld [vmem:[%s4346_s3 + $0x8] sm:$0xff]  ;;  %v1780_v17 = vld [vmem:[%s4346_s3 + $0x98] sm:$0xff]  ;;  %v1763_v18 = vld [vmem:[%s4346_s3 + $0x10] sm:$0xff] }
 0x1b8   : > { %1457 = vmatmul.mubr.f32.gmra.mrb[24].mxu1 %v1322_v24  ;;  %v1306_v30 = vsel %vm1299_vm11, %v1297_v55, %v1189_v21  ;;  %v1515_v56 = vsub.s32 5, %v3489_v47  ;;  %v2948_v11 = vpack.c.bf16 %v1778_v9, %v1777_v59  ;;  %v2950_v13 = vpack.c.bf16 %v1762_v12, %v1761_v10  ;;  %v1764_v21 = vld [vmem:[%s4346_s3 + $0x18] sm:$0xff]  ;;  %v1781_v55 = vld [vmem:[%s4346_s3 + $0xa0] sm:$0xff]  ;;  %v1766_v27 = vld [vmem:[%s4346_s3 + $0x28] sm:$0xff] }
 0x1b9   : > { %2661 = vmatprep.mubr.msk.f32.mxu1 %vm809_vm4, %v1035_v19  ;;  %v1315_v36 = vsel %vm1308_vm12, %v1306_v30, %v1221_v15  ;;  %v1779_v15 = vld [vmem:[%s4346_s3 + $0x90] sm:$0xff]  ;;  %v2954_v24 = vpack.c.bf16 %v1764_v21, %v1763_v18  ;;  %v1782_v19 = vld [vmem:[%s4346_s3 + $0xa8] sm:$0xff]  ;;  %v1784_v30 = vld [vmem:[%s4346_s3 + $0xb8] sm:$0xff] }
 0x1ba   : > { %v1191_v29 = vpop.permute.xlu0 %1190  ;;  %v3874_v61 = vrot.slane %v3860_v0, %v1515_v56  ;;  %2949 = vmatprep.subr.bf16.mxu0 %v2948_v11  ;;  %v2952_v20 = vpack.c.bf16 %v1780_v17, %v1779_v15  ;;  %v2956_v26 = vpack.c.bf16 %v1782_v19, %v1781_v55  ;;  %v1783_v28 = vld [vmem:[%s4346_s3 + $0xb0] sm:$0xff]  ;;  %v1785_v16 = vld [vmem:[%s4346_s3 + $0xc0] sm:$0xff]  ;;  %v1788_v10 = vld [vmem:[%s4346_s3 + $0xd8] sm:$0xff] }
 0x1bb   : > { %v1253_v32 = vpop.permute.xlu1 %1252  ;;  %v1307_v37 = vsel %vm1299_vm11, %v1298_v63, %v1191_v29  ;;  %2951 = vmatpush3.bf16.msra.mxu0 %v2950_v13  ;;  %v2958_v29 = vpack.c.bf16 %v1766_v27, %v1765_v40  ;;  %v1767_v31 = vld [vmem:[%s4346_s3 + $0x30] sm:$0xff]  ;;  %v2960_v63 = vpack.c.bf16 %v1784_v30, %v1783_v28  ;;  %v1772_v12 = vld [vmem:[%s4346_s3 + $0x58] sm:$0xff]  ;;  %v1789_v18 = vld [vmem:[%s4346_s3 + $0xe0] sm:$0xff]  ;;  %vm1997_vm11 = vcmask 519168  }
 0x1bc   : > { %1462 = vmatmul.mubr.f32.gmra.mrb[26].mxu1 %v1323_v33  ;;  %v1324_v42 = vsel %vm1317_vm13, %v1315_v36, %v1253_v32  ;;  %2953 = vmatprep.subr.bf16.mxu0 %v2952_v20  ;;  %v1768_v32 = vld [vmem:[%s4346_s3 + $0x38] sm:$0xff]  ;;  %v1787_v9 = vld [vmem:[%s4346_s3 + $0xd0] sm:$0xff]  ;;  %v1790_v20 = vld [vmem:[%s4346_s3 + $0xe8] sm:$0xff] }
 0x1bd   : > { %2662 = vmatprep.mubr.msk.f32.mxu1 %vm809_vm4, %v1037_v34  ;;  %v2968_v11 = vpack.c.bf16 %v1788_v10, %v1787_v9  ;;  %v1773_v21 = vld [vmem:[%s4346_s3 + $0x60] sm:$0xff]  ;;  %v2972_v19 = vpack.c.bf16 %v1790_v20, %v1789_v18 }
 0x1be   : > { %v1255_v50 = vpop.permute.xlu0 %1254 }
 0x1bf   : > { %v1223_v41 = vpop.permute.xlu1 %1222  ;;  %2955 = vmatpush3.bf16.msra.mxu0 %v2954_v24 }
 0x1c0   : > { %v1316_v45 = vsel %vm1308_vm12, %v1307_v37, %v1223_v41  ;;  %1467 = vmatmul.mubr.f32.gmra.mrb[28].mxu1 %v1324_v42  ;;  %2957 = vmatprep.subr.bf16.mxu0 %v2956_v26  ;;  %v2962_v41 = vpack.c.bf16 %v1768_v32, %v1767_v31 }
 0x1c1   : > { %2663 = vmatprep.mubr.msk.f32.mxu1 %vm809_vm4, %v1039_v5  ;;  %v1325_v43 = vsel %vm1317_vm13, %v1316_v45, %v1255_v50  ;;  %vm2467_vm13 = vcmask 1043456  }
 0x1c3   : > { %2959 = vmatpush3.bf16.msra.mxu0 %v2958_v29 }
 0x1c4   : > { %1472 = vmatmul.mubr.f32.gmra.mrb[30].mxu1 %v1325_v43  ;;  %2961 = vmatprep.subr.bf16.mxu0 %v2960_v63  ;;  %v1792_v63 = vld [vmem:[%s4346_s3 + $0xf8] sm:$0xff] }
 0x1c7   : > { %2963 = vmatpush3.bf16.msra.mxu0 %v2962_v41  ;;  %v1775_v41 = vld [vmem:[%s4346_s3 + $0x70] sm:$0xff] }
 0x26d   : > { %v1438_v54 = vpop.f32.mrb[16].mxu1 }
 0x26e   : > { %v1439_v57 = vadd.f32 %v1438_v54, %v3865_v52  ;;  %v1440_v58 = vpop.f32.mrb[17].mxu1  ;;  %v1786_v54 = vld [vmem:[%s4346_s3 + $0xc8] sm:$0xff] }
 0x26f   : > { %v1769_v58 = vld [vmem:[%s4346_s3 + $0x40] sm:$0xff] }
 0x270   : > { %vm1477_vm4 = vcmp.gt.f32.partialorder %v1439_v57, 0.0  ;;  %v1485_v60 = vmul.f32 0.2, %v1439_v57 }
 0x271   : > { %v1443_v2 = vpop.f32.mrb[18].mxu1 }
 0x272   : > { %v1493_v3 = vsel %vm1477_vm4, %v1439_v57, %v1485_v60  ;;  %v1444_v1 = vadd.f32 %v1443_v2, %v3865_v52  ;;  %v1445_v44 = vpop.f32.mrb[19].mxu1  ;;  %v2964_v57 = vpack.c.bf16 %v1786_v54, %v1785_v16  ;;  %v1770_v60 = vld [vmem:[%s4346_s3 + $0x48] sm:$0xff] }
 0x273   : > { %v1505_v7 = vmul.f32 %v3871_v22, %v1493_v3  ;;  %v2966_v3 = vpack.c.bf16 %v1770_v60, %v1769_v58 }
 0x274   : > { %vm1478_vm15 = vcmp.gt.f32.partialorder %v1444_v1, 0.0  ;;  %v1486_v62 = vmul.f32 0.2, %v1444_v1  ;;  %2965 = vmatprep.subr.bf16.mxu0 %v2964_v57 }
 0x275   : > { %v1517_v6 = vadd.f32 %v3874_v61, %v1505_v7  ;;  %2967 = vmatpush3.bf16.msra.mxu0 %v2966_v3 }
 0x276   : > { %v1494_v8 = vsel %vm1478_vm15, %v1444_v1, %v1486_v62  ;;  %2969 = vmatprep.subr.bf16.mxu0 %v2968_v11 }
 0x277   : > { %1547 = vst.msk [vmem:[#allocation3 + $0x11] sm:$0xff] %vm1272_vm6, %v1517_v6  ;;  %v1506_v4 = vmul.f32 %v3871_v22, %v1494_v8 }
 0x279   : > { %v1518_v14 = vadd.f32 %v3874_v61, %v1506_v4  ;;  %v1771_v4 = vld [vmem:[%s4346_s3 + $0x50] sm:$0xff] }
 0x27a   : > { %v2970_v15 = vpack.c.bf16 %v1772_v12, %v1771_v4 }
 0x27b   : > { %1548 = vst.msk [vmem:[#allocation3 + $0x21] sm:$0xff] %vm1272_vm6, %v1518_v14 }
 0x27c   : > { %2971 = vmatpush3.bf16.msra.mxu0 %v2970_v15  ;;  %v1630_v15 = vpop.permute.xlu1 %1629 }
 0x27d   : > { %2973 = vmatprep.subr.bf16.mxu0 %v2972_v19 }
 0x27e   : > { %v1594_v25 = vld [vmem:[#allocation3 + $0x12] ss:$2 sm:$0xf] }
 0x27f   : > { %1677 = vrot.lane.b32.xlu1 %v1594_v25, %s3230_s28  ;;  %v1578_v23 = vld [vmem:[#allocation3 + $0x10] ss:$2 sm:$0xf] }
 0x282   : > { %v1448_v33 = vpop.f32.mrb[20].mxu1  ;;  %v1565_v34 = vld [vmem:[#allocation3 + $0x21] ss:$2 sm:$0xf] }
 0x283   : > { %v1449_v36 = vadd.f32 %v1448_v33, %v3865_v52  ;;  %v1450_v37 = vpop.f32.mrb[21].mxu1  ;;  %1631 = vrot.lane.b32.xlu0 %v1565_v34, %s3230_s28  ;;  %1661 = vrot.lane.b32.xlu1 %v1578_v23, %s3234_s30  ;;  %v1573_v45 = vld [vmem:[#allocation3 + $0x22] ss:$2 sm:$0xf]  ;;  %v1774_v23 = vld [vmem:[%s4346_s3 + $0x68] sm:$0xff] }
 0x284   : > { %v1602_v5 = vld [vmem:[#allocation3 + $0x20] ss:$2 sm:$0xf]  ;;  %v1610_v44 = vld [vmem:[#allocation3 + $0x21] ss:$2 sm:$0xf]  ;;  %v2974_v40 = vpack.c.bf16 %v1774_v23, %v1773_v21 }
 0x285   : > { %vm1479_vm0 = vcmp.gt.f32.partialorder %v1449_v36, 0.0  ;;  %v1487_v42 = vmul.f32 0.2, %v1449_v36  ;;  %v1791_v34 = vld [vmem:[%s4346_s3 + $0xf0] sm:$0xff] }
 0x286   : > { %v1453_v50 = vpop.f32.mrb[22].mxu1  ;;  %2975 = vmatpush3.bf16.msra.mxu0 %v2974_v40  ;;  %v2976_v37 = vpack.c.bf16 %v1792_v63, %v1791_v34  ;;  %v1555_v40 = vld [vmem:[#allocation3] ss:$2 sm:$0xf] }
 0x287   : > { %v1495_v43 = vsel %vm1479_vm0, %v1449_v36, %v1487_v42  ;;  %v1454_v38 = vadd.f32 %v1453_v50, %v3865_v52  ;;  %v1455_v46 = vpop.f32.mrb[23].mxu1  ;;  %1647 = vrot.lane.b32.xlu0 %v1573_v45, %s3233_s16  ;;  %1693 = vrot.lane.b32.xlu1 %v1602_v5, %s3233_s16  ;;  %v1776_v42 = vld [vmem:[%s4346_s3 + $0x78] sm:$0xff] }
 0x288   : > { %v1507_v56 = vmul.f32 %v3871_v22, %v1495_v43  ;;  %v2978_v5 = vpack.c.bf16 %v1776_v42, %v1775_v41  ;;  %2977 = vmatprep.subr.bf16.mxu0 %v2976_v37 }
 0x289   : > { %vm1480_vm1 = vcmp.gt.f32.partialorder %v1454_v38, 0.0  ;;  %v1488_v2 = vmul.f32 0.2, %v1454_v38 }
 0x28a   : > { %v1519_v1 = vadd.f32 %v3874_v61, %v1507_v56  ;;  %2979 = vmatpush3.bf16.msra.mxu0 %v2978_v5  ;;  %v1795_v5 = vld [vmem:[%s4346_s3 + $0x110] sm:$0xff] }
 0x28b   : > { %v1496_v7 = vsel %vm1480_vm1, %v1454_v38, %v1488_v2  ;;  %v1458_v62 = vpop.f32.mrb[24].mxu1  ;;  %1709 = vrot.lane.b32.xlu1 %v1610_v44, %s3234_s30 }
 0x28c   : > { %1549 = vst.msk [vmem:[#allocation3 + $0x31] sm:$0xff] %vm1272_vm6, %v1519_v1  ;;  %v1508_v6 = vmul.f32 %v3871_v22, %v1496_v7  ;;  %v1459_v8 = vadd.f32 %v1458_v62, %v3865_v52  ;;  %v1460_v59 = vpop.f32.mrb[25].mxu1 }
 0x28e   : > { %v1520_v13 = vadd.f32 %v3874_v61, %v1508_v6  ;;  %vm1481_vm2 = vcmp.gt.f32.partialorder %v1459_v8, 0.0  ;;  %v1489_v14 = vmul.f32 0.2, %v1459_v8 }
 0x28f   : > { %v1463_v17 = vpop.f32.mrb[26].mxu1 }
 0x290   : > { %1550 = vst.msk [vmem:[#allocation3 + $0x41] sm:$0xff] %vm1272_vm6, %v1520_v13  ;;  %v1497_v24 = vsel %vm1481_vm2, %v1459_v8, %v1489_v14  ;;  %v1464_v25 = vadd.f32 %v1463_v17, %v3865_v52  ;;  %v1465_v55 = vpop.f32.mrb[27].mxu1  ;;  %v1646_v17 = vpop.permute.xlu1 %1645 }
 0x291   : > { %v1509_v26 = vmul.f32 %v3871_v22, %v1497_v24 }
 0x292   : > { %vm1482_vm3 = vcmp.gt.f32.partialorder %v1464_v25, 0.0  ;;  %v1490_v27 = vmul.f32 0.2, %v1464_v25 }
 0x293   : > { %v1521_v28 = vadd.f32 %v3874_v61, %v1509_v26  ;;  %v1468_v29 = vpop.f32.mrb[28].mxu1  ;;  %v1596_v30 = vld [vmem:[#allocation3 + $0x32] ss:$2 sm:$0xf] }
 0x294   : > { %v1498_v31 = vsel %vm1482_vm3, %v1464_v25, %v1490_v27  ;;  %v1469_v32 = vadd.f32 %v1468_v29, %v3865_v52  ;;  %v1470_v33 = vpop.f32.mrb[29].mxu1  ;;  %1679 = vrot.lane.b32.xlu0 %v1596_v30, %s3230_s28  ;;  %v1580_v50 = vld [vmem:[#allocation3 + $0x30] ss:$2 sm:$0xf]  ;;  %v1721_v27 = vsel %vm1272_vm6, %v1555_v40, %v1630_v15 }
 0x295   : > { %1551 = vst.msk [vmem:[#allocation3 + $0x51] sm:$0xff] %vm1272_vm6, %v1521_v28  ;;  %v1510_v36 = vmul.f32 %v3871_v22, %v1498_v31  ;;  %v1557_v29 = vld [vmem:[#allocation3 + $0x20] ss:$2 sm:$0xf]  ;;  %v1725_v34 = vsel %vm1290_vm10, %v1721_v27, %v1646_v17 }
 0x296   : > { %vm1483_vm5 = vcmp.gt.f32.partialorder %v1469_v32, 0.0  ;;  %v1491_v45 = vmul.f32 0.2, %v1469_v32  ;;  %v1586_v30 = vld [vmem:[#allocation3 + $0x11] ss:$2 sm:$0xf] }
 0x297   : > { %v1522_v43 = vadd.f32 %v3874_v61, %v1510_v36  ;;  %v1473_v38 = vpop.f32.mrb[30].mxu1  ;;  %v1567_v46 = vld [vmem:[#allocation3 + $0x41] ss:$2 sm:$0xf] }
 0x298   : > { %v1499_v16 = vsel %vm1483_vm5, %v1469_v32, %v1491_v45  ;;  %v1474_v54 = vadd.f32 %v1473_v38, %v3865_v52  ;;  %v1475_v56 = vpop.f32.mrb[31].mxu1  ;;  %1663 = vrot.lane.b32.xlu0 %v1580_v50, %s3234_s30  ;;  %1633 = vrot.lane.b32.xlu1 %v1567_v46, %s3230_s28  ;;  %v1604_v2 = vld [vmem:[#allocation3 + $0x40] ss:$2 sm:$0xf] }
 0x299   : > { %1552 = vst.msk [vmem:[#allocation3 + $0x61] sm:$0xff] %vm1272_vm6, %v1522_v43  ;;  %v1511_v57 = vmul.f32 %v3871_v22, %v1499_v16  ;;  %v1575_v3 = vld [vmem:[#allocation3 + $0x42] ss:$2 sm:$0xf] }
 0x29a   : > { %vm1484_vm7 = vcmp.gt.f32.partialorder %v1474_v54, 0.0  ;;  %v1492_v58 = vmul.f32 0.2, %v1474_v54  ;;  %v1612_v7 = vld [vmem:[#allocation3 + $0x41] ss:$2 sm:$0xf] }
 0x29b   : > { %v1523_v60 = vadd.f32 %v3874_v61, %v1511_v57  ;;  %v1588_v32 = vld [vmem:[#allocation3 + $0x31] ss:$2 sm:$0xf]  ;;  %v1796_v43 = vld [vmem:[%s4346_s3 + $0x118] sm:$0xff] }
 0x29c   : > { %v1500_v1 = vsel %vm1484_vm7, %v1474_v54, %v1492_v58  ;;  %1695 = vrot.lane.b32.xlu0 %v1604_v2, %s3233_s16  ;;  %1649 = vrot.lane.b32.xlu1 %v1575_v3, %s3233_s16  ;;  %v1598_v62 = vld [vmem:[#allocation3 + $0x52] ss:$2 sm:$0xf]  ;;  %v2984_v57 = vpack.c.bf16 %v1796_v43, %v1795_v5 }
 0x29d   : > { %1553 = vst.msk [vmem:[#allocation3 + $0x71] sm:$0xff] %vm1272_vm6, %v1523_v60  ;;  %v1512_v52 = vmul.f32 %v3871_v22, %v1500_v1  ;;  %v1793_v22 = vld [vmem:[%s4346_s3 + $0x100] sm:$0xff]  ;;  %v2151_v5 = vld [vmem:[%s4347_s4 + $0x88] sm:$0xff] }
 0x29e   : > { %v1582_v11 = vld [vmem:[#allocation3 + $0x50] ss:$2 sm:$0xf] }
 0x29f   : > { %v1524_v44 = vadd.f32 %v3874_v61, %v1512_v52  ;;  %v1794_v61 = vld [vmem:[%s4346_s3 + $0x108] sm:$0xff] }
 0x2a0   : > { %1711 = vrot.lane.b32.xlu0 %v1612_v7, %s3234_s30  ;;  %1681 = vrot.lane.b32.xlu1 %v1598_v62, %s3230_s28  ;;  %v1569_v6 = vld [vmem:[#allocation3 + $0x61] ss:$2 sm:$0xf]  ;;  %v1606_v8 = vld [vmem:[#allocation3 + $0x60] ss:$2 sm:$0xf]  ;;  %v2980_v10 = vpack.c.bf16 %v1794_v61, %v1793_v22 }
 0x2a1   : > { %1554 = vst.msk [vmem:[#allocation3 + $0x81] sm:$0xff] %vm1272_vm6, %v1524_v44  ;;  %v1577_v59 = vld [vmem:[#allocation3 + $0x62] ss:$2 sm:$0xf] }
 0x2a2   : > { %v1614_v9 = vld [vmem:[#allocation3 + $0x61] ss:$2 sm:$0xf]  ;;  %2981 = vmatprep.subr.bf16.mxu0 %v2980_v10  ;;  %v1590_v7 = vld [vmem:[#allocation3 + $0x51] ss:$2 sm:$0xf] }
 0x2a4   : > { %1635 = vrot.lane.b32.xlu0 %v1569_v6, %s3230_s28  ;;  %1697 = vrot.lane.b32.xlu1 %v1606_v8, %s3233_s16  ;;  %v1600_v4 = vld [vmem:[#allocation3 + $0x72] ss:$2 sm:$0xf]  ;;  %v1592_v62 = vld [vmem:[#allocation3 + $0x71] ss:$2 sm:$0xf] }
 0x2a5   : > { %v1584_v14 = vld [vmem:[#allocation3 + $0x70] ss:$2 sm:$0xf] }
 0x2a8   : > { %1651 = vrot.lane.b32.xlu0 %v1577_v59, %s3233_s16  ;;  %1713 = vrot.lane.b32.xlu1 %v1614_v9, %s3234_s30  ;;  %v1608_v12 = vld [vmem:[#allocation3 + $0x80] ss:$2 sm:$0xf]  ;;  %v1616_v13 = vld [vmem:[#allocation3 + $0x81] ss:$2 sm:$0xf] }
 0x2a9   : > { %v1624_v40 = vld [vmem:[#allocation3 + $0x82] ss:$2 sm:$0xf] }
 0x2ac   : > { %1683 = vrot.lane.b32.xlu0 %v1600_v4, %s3230_s28  ;;  %1665 = vrot.lane.b32.xlu1 %v1582_v11, %s3234_s30  ;;  %v1559_v4 = vld [vmem:[#allocation3 + $0x40] ss:$2 sm:$0xf] }
 0x2ad   : > { %v1561_v11 = vld [vmem:[#allocation3 + $0x60] ss:$2 sm:$0xf] }
 0x2b0   : > { %1699 = vrot.lane.b32.xlu0 %v1608_v12, %s3233_s16 }
 0x2b4   : > { %1715 = vrot.lane.b32.xlu0 %v1616_v13, %s3234_s30 }
 0x2b8   : > { %1667 = vrot.lane.b32.xlu0 %v1584_v14, %s3234_s30 }
 0x2f1   : > { %v1678_v18 = vpop.permute.xlu1 %1677 }
 0x2f2   : > { %v1733_v63 = vsel %vm1272_vm6, %v1586_v30, %v1678_v18  ;;  %v2166_v30 = vld [vmem:[%s4347_s4 + $0x100] sm:$0xff] }
 0x2f5   : > { %v1662_v20 = vpop.permute.xlu1 %1661  ;;  %v1632_v21 = vpop.permute.xlu0 %1631 }
 0x2f6   : > { %v1722_v31 = vsel %vm1272_vm6, %v1557_v29, %v1632_v21  ;;  %v1729_v16 = vsel %vm1308_vm12, %v1725_v34, %v1662_v20  ;;  %v1620_v21 = vld [vmem:[#allocation3 + $0x42] ss:$2 sm:$0xf]  ;;  %v2183_v29 = vld [vmem:[%s4347_s4 + $0x188] sm:$0xff] }
 0x2f7   : > { %v2185_v34 = vld [vmem:[%s4347_s4 + $0x198] sm:$0xff] }
 0x2f9   : > { %v1694_v24 = vpop.permute.xlu1 %1693  ;;  %v1648_v25 = vpop.permute.xlu0 %1647 }
 0x2fa   : > { %v1726_v36 = vsel %vm1290_vm10, %v1722_v31, %v1648_v25  ;;  %v1737_v41 = vsel %vm1290_vm10, %v1733_v63, %v1694_v24 }
 0x2fd   : > { %v1710_v55 = vpop.permute.xlu1 %1709 }
 0x2fe   : > { %v1741_v38 = vsel %vm1308_vm12, %v1737_v41, %v1710_v55  ;;  %v2169_v41 = vld [vmem:[%s4347_s4 + $0x118] sm:$0xff] }
 0x306   : > { %v1680_v19 = vpop.permute.xlu0 %1679 }
 0x307   : > { %v1734_v37 = vsel %vm1272_vm6, %v1588_v32, %v1680_v19  ;;  %v1618_v19 = vld [vmem:[#allocation3 + $0x22] ss:$2 sm:$0xf]  ;;  %v2167_v32 = vld [vmem:[%s4347_s4 + $0x108] sm:$0xff] }
 0x308   : > { %v3022_v63 = vpack.c.bf16 %v2167_v32, %v2166_v30 }
 0x30a   : > { %v1664_v23 = vpop.permute.xlu0 %1663  ;;  %v1634_v26 = vpop.permute.xlu1 %1633 }
 0x30b   : > { %v1730_v42 = vsel %vm1308_vm12, %v1726_v36, %v1664_v23  ;;  %v1723_v14 = vsel %vm1272_vm6, %v1559_v4, %v1634_v26  ;;  %v1803_v23 = vcombine.low %v1618_v19, %v1620_v21  ;;  %v1622_v26 = vld [vmem:[#allocation3 + $0x62] ss:$2 sm:$0xf]  ;;  %v1973_v21 = vsub.s32 7, %v3489_v47 }
 0x30c   : > { %v2664_v56 = vcombine.low %v1729_v16, %v1730_v42  ;;  %v1806_v27 = vcombine.low %v1622_v26, %v1624_v40  ;;  %v2186_v42 = vld [vmem:[%s4347_s4 + $0x1a0] sm:$0xff] }
 0x30d   : > { %v2134_v16 = vld [vmem:[%s4347_s4] sm:$0xff] }
 0x30e   : > { %v1696_v28 = vpop.permute.xlu0 %1695  ;;  %v1650_v33 = vpop.permute.xlu1 %1649 }
 0x30f   : > { %v1738_v45 = vsel %vm1290_vm10, %v1734_v37, %v1696_v28  ;;  %v1727_v17 = vsel %vm1290_vm10, %v1723_v14, %v1650_v33  ;;  %v2182_v28 = vld [vmem:[%s4347_s4 + $0x180] sm:$0xff]  ;;  %v2184_v33 = vld [vmem:[%s4347_s4 + $0x190] sm:$0xff]  ;;  %v1799_v14 = vsub.s32 6, %v3489_v47 }
 0x310   : > { %v3020_v31 = vpack.c.bf16 %v2183_v29, %v2182_v28  ;;  %v3024_v36 = vpack.c.bf16 %v2185_v34, %v2184_v33  ;;  %v2168_v37 = vld [vmem:[%s4347_s4 + $0x110] sm:$0xff]  ;;  %v2154_v33 = vld [vmem:[%s4347_s4 + $0xa0] sm:$0xff]  ;;  %v2155_v34 = vld [vmem:[%s4347_s4 + $0xa8] sm:$0xff] }
 0x311   : > { %v3026_v43 = vpack.c.bf16 %v2169_v41, %v2168_v37  ;;  %v2996_v37 = vpack.c.bf16 %v2155_v34, %v2154_v33  ;;  %v2138_v41 = vld [vmem:[%s4347_s4 + $0x20] sm:$0xff] }
 0x312   : > { %v1712_v50 = vpop.permute.xlu0 %1711  ;;  %v1682_v58 = vpop.permute.xlu1 %1681  ;;  %3021 = vmatprep.subr.bf16.mxu1 %v3020_v31 }
 0x313   : > { %v1742_v46 = vsel %vm1308_vm12, %v1738_v45, %v1712_v50  ;;  %v1735_v6 = vsel %vm1272_vm6, %v1590_v7, %v1682_v58  ;;  %v2187_v45 = vld [vmem:[%s4347_s4 + $0x1a8] sm:$0xff]  ;;  %v2150_v50 = vld [vmem:[%s4347_s4 + $0x80] sm:$0xff]  ;;  %3023 = vmatpush3.bf16.msra.mxu1 %v3022_v63  ;;  %v2188_v58 = vld [vmem:[%s4347_s4 + $0x1b0] sm:$0xff] }
 0x314   : > { %v2665_v54 = vcombine.low %v1741_v38, %v1742_v46  ;;  %v2988_v38 = vpack.c.bf16 %v2151_v5, %v2150_v50  ;;  %v2170_v46 = vld [vmem:[%s4347_s4 + $0x120] sm:$0xff]  ;;  %3025 = vmatprep.subr.bf16.mxu1 %v3024_v36  ;;  %v2137_v7 = vld [vmem:[%s4347_s4 + $0x18] sm:$0xff]  ;;  %v2192_v5 = vld [vmem:[%s4347_s4 + $0x1d0] sm:$0xff] }
 0x316   : > { %v1636_v60 = vpop.permute.xlu0 %1635  ;;  %1879 = vmatprep.mubr.f32.mxu0 %v2665_v54  ;;  %v1698_v3 = vpop.permute.xlu1 %1697  ;;  %v3028_v54 = vpack.c.bf16 %v2187_v45, %v2186_v42  ;;  %v2139_v42 = vld [vmem:[%s4347_s4 + $0x28] sm:$0xff] }
 0x317   : > { %1880 = vmatmul.mubr.f32.vlgmr.msra.gmra.mrb[16].mxu0 %v2664_v56  ;;  %v1739_v59 = vsel %vm1290_vm10, %v1735_v6, %v1698_v3  ;;  %v1724_v15 = vsel %vm1272_vm6, %v1561_v11, %v1636_v60  ;;  %v2171_v56 = vld [vmem:[%s4347_s4 + $0x128] sm:$0xff]  ;;  %v2152_v3 = vld [vmem:[%s4347_s4 + $0x90] sm:$0xff]  ;;  %3027 = vmatpush3.bf16.msra.mxu1 %v3026_v43  ;;  %v2998_v50 = vpack.c.bf16 %v2139_v42, %v2138_v41  ;;  %v2193_v43 = vld [vmem:[%s4347_s4 + $0x1d8] sm:$0xff] }
 0x318   : > { %2983 = vmatpush3.bf16.msra.mxu0 %v2980_v10  ;;  %3029 = vmatprep.subr.bf16.mxu1 %v3028_v54 }
 0x319   : > { %2985 = vmatprep.subr.bf16.mxu0 %v2984_v57 }
 0x31a   : > { %v1652_v2 = vpop.permute.xlu0 %1651  ;;  %v1714_v52 = vpop.permute.xlu1 %1713 }
 0x31b   : > { %v1743_v61 = vsel %vm1308_vm12, %v1739_v59, %v1714_v52  ;;  %v1728_v18 = vsel %vm1290_vm10, %v1724_v15, %v1652_v2  ;;  %v2189_v2 = vld [vmem:[%s4347_s4 + $0x1b8] sm:$0xff]  ;;  %v2172_v59 = vld [vmem:[%s4347_s4 + $0x130] sm:$0xff] }
 0x31c   : > { %2987 = vmatpush3.bf16.msra.mxu0 %v2984_v57  ;;  %v2135_v57 = vld [vmem:[%s4347_s4 + $0x8] sm:$0xff] }
 0x31d   : > { %2989 = vmatprep.subr.bf16.mxu0 %v2988_v38  ;;  %v2990_v60 = vpack.c.bf16 %v2135_v57, %v2134_v16  ;;  %v3040_v16 = vpack.c.bf16 %v2193_v43, %v2192_v5  ;;  %v2156_v57 = vld [vmem:[%s4347_s4 + $0xb0] sm:$0xff]  ;;  %v2149_v43 = vld [vmem:[%s4347_s4 + $0x78] sm:$0xff] }
 0x31e   : > { %v1684_v1 = vpop.permute.xlu0 %1683  ;;  %v1666_v12 = vpop.permute.xlu1 %1665  ;;  %v2148_v5 = vld [vmem:[%s4347_s4 + $0x70] sm:$0xff] }
 0x31f   : > { %v1736_v8 = vsel %vm1272_vm6, %v1592_v62, %v1684_v1  ;;  %v1731_v24 = vsel %vm1308_vm12, %v1727_v17, %v1666_v12  ;;  %v2153_v1 = vld [vmem:[%s4347_s4 + $0x98] sm:$0xff]  ;;  %v3030_v62 = vpack.c.bf16 %v2171_v56, %v2170_v46  ;;  %v1800_v17 = vrot.slane %v3860_v0, %v1799_v14 }
 0x320   : > { %v2992_v52 = vpack.c.bf16 %v2153_v1, %v2152_v3  ;;  %v2177_v3 = vld [vmem:[%s4347_s4 + $0x158] sm:$0xff]  ;;  %v2140_v1 = vld [vmem:[%s4347_s4 + $0x30] sm:$0xff] }
 0x321   : > { %3031 = vmatpush3.bf16.msra.mxu1 %v3030_v62  ;;  %v2194_v62 = vld [vmem:[%s4347_s4 + $0x1e0] sm:$0xff] }
 0x322   : > { %v1700_v44 = vpop.permute.xlu0 %1699 }
 0x323   : > { %v1740_v9 = vsel %vm1290_vm10, %v1736_v8, %v1700_v44  ;;  %v2136_v44 = vld [vmem:[%s4347_s4 + $0x10] sm:$0xff]  ;;  %v3032_v8 = vpack.c.bf16 %v2189_v2, %v2188_v58  ;;  %v2157_v58 = vld [vmem:[%s4347_s4 + $0xb8] sm:$0xff] }
 0x324   : > { %v2994_v6 = vpack.c.bf16 %v2137_v7, %v2136_v44  ;;  %v3000_v2 = vpack.c.bf16 %v2157_v58, %v2156_v57 }
 0x325   : > { %3033 = vmatprep.subr.bf16.mxu1 %v3032_v8 }
 0x326   : > { %v1716_v22 = vpop.permute.xlu0 %1715 }
 0x327   : > { %v1744_v10 = vsel %vm1308_vm12, %v1740_v9, %v1716_v22  ;;  %v2173_v9 = vld [vmem:[%s4347_s4 + $0x138] sm:$0xff]  ;;  %v2190_v22 = vld [vmem:[%s4347_s4 + $0x1c0] sm:$0xff] }
 0x328   : > { %v2667_v13 = vcombine.low %v1743_v61, %v1744_v10  ;;  %v2191_v61 = vld [vmem:[%s4347_s4 + $0x1c8] sm:$0xff]  ;;  %v3034_v10 = vpack.c.bf16 %v2173_v9, %v2172_v59  ;;  %v2158_v59 = vld [vmem:[%s4347_s4 + $0xc0] sm:$0xff] }
 0x329   : > { %v3036_v4 = vpack.c.bf16 %v2191_v61, %v2190_v22  ;;  %v2159_v9 = vld [vmem:[%s4347_s4 + $0xc8] sm:$0xff]  ;;  %v2178_v22 = vld [vmem:[%s4347_s4 + $0x160] sm:$0xff] }
 0x32a   : > { %v1668_v20 = vpop.permute.xlu0 %1667  ;;  %1884 = vmatprep.mubr.f32.mxu0 %v2667_v13  ;;  %3035 = vmatpush3.bf16.msra.mxu1 %v3034_v10  ;;  %v3004_v61 = vpack.c.bf16 %v2159_v9, %v2158_v59  ;;  %v2179_v10 = vld [vmem:[%s4347_s4 + $0x168] sm:$0xff] }
 0x32b   : > { %v1732_v25 = vsel %vm1308_vm12, %v1728_v18, %v1668_v20  ;;  %3037 = vmatprep.subr.bf16.mxu1 %v3036_v4  ;;  %v2142_v4 = vld [vmem:[%s4347_s4 + $0x40] sm:$0xff]  ;;  %v3046_v14 = vpack.c.bf16 %v2179_v10, %v2178_v22  ;;  %vm3237_vm12 = vmmov 0  }
 0x32c   : > { %v2666_v55 = vcombine.low %v1731_v24, %v1732_v25 }
 0x32e   : > { %1885 = vmatmul.mubr.f32.gmra.mrb[18].mxu0 %v2666_v55 }
 0x32f   : > { %2893 = vmatprep.mubr.msk.f32.mxu0 %vm1272_vm6, %v1803_v23  ;;  %v4152_v23 = vld [vmem:[%s4349_s6 + $0x8] sm:$0xff] }
 0x330   : > { %v1980_v30 = vrot.slane %v4152_v23, %v313_v48  ;;  %v2175_v48 = vld [vmem:[%s4347_s4 + $0x148] sm:$0xff] }
 0x332   : > { %2894 = vmatmul.mubr.msk.f32.vlgmr.msra.gmra.mrb[20].mxu0 %vm1272_vm6, %v1806_v27  ;;  %v1974_v27 = vrot.slane %v3860_v0, %v1973_v21  ;;  %v2174_v0 = vld [vmem:[%s4347_s4 + $0x140] sm:$0xff]  ;;  %v2196_v21 = vld [vmem:[%s4347_s4 + $0x1f0] sm:$0xff] }
 0x333   : > { %2991 = vmatpush3.bf16.msra.mxu0 %v2990_v60  ;;  %v3038_v45 = vpack.c.bf16 %v2175_v48, %v2174_v0  ;;  %v2176_v60 = vld [vmem:[%s4347_s4 + $0x150] sm:$0xff]  ;;  %v2163_v0 = vld [vmem:[%s4347_s4 + $0xe8] sm:$0xff] }
 0x334   : > { %2993 = vmatprep.subr.bf16.mxu0 %v2992_v52  ;;  %v2141_v52 = vld [vmem:[%s4347_s4 + $0x38] sm:$0xff]  ;;  %v3042_v44 = vpack.c.bf16 %v2177_v3, %v2176_v60  ;;  %v2164_v48 = vld [vmem:[%s4347_s4 + $0xf0] sm:$0xff] }
 0x335   : > { %3039 = vmatpush3.bf16.msra.mxu1 %v3038_v45  ;;  %v3002_v7 = vpack.c.bf16 %v2141_v52, %v2140_v1  ;;  %v2165_v45 = vld [vmem:[%s4347_s4 + $0xf8] sm:$0xff] }
 0x336   : > { %3041 = vmatprep.subr.bf16.mxu1 %v3040_v16 }
 0x337   : > { %2995 = vmatpush3.bf16.msra.mxu0 %v2994_v6  ;;  %v2195_v6 = vld [vmem:[%s4347_s4 + $0x1e8] sm:$0xff] }
 0x338   : > { %2997 = vmatprep.subr.bf16.mxu0 %v2996_v37  ;;  %v3044_v8 = vpack.c.bf16 %v2195_v6, %v2194_v62  ;;  %v2147_v37 = vld [vmem:[%s4347_s4 + $0x68] sm:$0xff] }
 0x339   : > { %3043 = vmatpush3.bf16.msra.mxu1 %v3042_v44 }
 0x33a   : > { %3045 = vmatprep.subr.bf16.mxu1 %v3044_v8 }
 0x33b   : > { %2999 = vmatpush3.bf16.msra.mxu0 %v2998_v50  ;;  %v3016_v50 = vpack.c.bf16 %v2165_v45, %v2164_v48 }
 0x33c   : > { %3001 = vmatprep.subr.bf16.mxu0 %v3000_v2 }
 0x33d   : > { %3047 = vmatpush3.bf16.msra.mxu1 %v3046_v14  ;;  %v2198_v14 = vld [vmem:[%s4347_s4 + $0x200] sm:$0xff] }
 0x33f   : > { %3003 = vmatpush3.bf16.msra.mxu0 %v3002_v7 }
 0x340   : > { %3005 = vmatprep.subr.bf16.mxu0 %v3004_v61 }
 0x3ea   : > { %v2742_v11 = vpop.f32.mrb[16].mxu0 }
 0x3eb   : > { %v2743_v12 = vpop.f32.mrb[17].mxu0 }
 0x3ec   : > { %v2744_v13 = vadd.f32 %v2743_v12, %v2742_v11  ;;  %v2143_v11 = vld [vmem:[%s4347_s4 + $0x48] sm:$0xff] }
 0x3ee   : > { %v1882_v55 = vadd.f32 %v2744_v13, %v1800_v17 }
 0x401   : > { %v2745_v15 = vpop.f32.mrb[18].mxu0 }
 0x402   : > { %v2746_v18 = vpop.f32.mrb[19].mxu0 }
 0x403   : > { %v2747_v20 = vadd.f32 %v2746_v18, %v2745_v15  ;;  %v3006_v15 = vpack.c.bf16 %v2143_v11, %v2142_v4 }
 0x405   : > { %v1887_v24 = vadd.f32 %v2747_v20, %v1800_v17  ;;  %v2895_v25 = vpop.f32.mrb[20].mxu0  ;;  %3007 = vmatpush3.bf16.msra.mxu0 %v3006_v15  ;;  %v2006_v20 = vld [vmem:[#allocation4 + $0x1] ss:$2 sm:$0x3]  ;;  %v2199_v15 = vld [vmem:[%s4347_s4 + $0x208] sm:$0xff] }
 0x406   : > { %v1956_v19 = vpop.f32.mrb[21].mxu0 }
 0x407   : > { %v1962_v40 = vadd.f32 %v2895_v25, %v1887_v24  ;;  %v1957_v26 = vadd.f32 %v1956_v19, %v1882_v55  ;;  %v2197_v24 = vld [vmem:[%s4347_s4 + $0x1f8] sm:$0xff]  ;;  %v2160_v19 = vld [vmem:[%s4347_s4 + $0xd0] sm:$0xff] }
 0x408   : > { %v3048_v55 = vpack.c.bf16 %v2197_v24, %v2196_v21 }
 0x409   : > { %vm1966_vm6 = vcmp.gt.f32.partialorder %v1962_v40, 0.0  ;;  %v1968_v28 = vmul.f32 0.2, %v1962_v40  ;;  %vm1965_vm9 = vcmp.gt.f32.partialorder %v1957_v26, 0.0  ;;  %v1967_v29 = vmul.f32 0.2, %v1957_v26 }
 0x40a   : > { %3049 = vmatprep.subr.bf16.mxu1 %v3048_v55 }
 0x40b   : > { %v1970_v31 = vsel %vm1966_vm6, %v1962_v40, %v1968_v28  ;;  %v1969_v32 = vsel %vm1965_vm9, %v1957_v26, %v1967_v29  ;;  %v2161_v40 = vld [vmem:[%s4347_s4 + $0xd8] sm:$0xff]  ;;  %v2144_v29 = vld [vmem:[%s4347_s4 + $0x50] sm:$0xff] }
 0x40c   : > { %v1976_v63 = vmul.f32 %v1974_v27, %v1970_v31  ;;  %v1975_v36 = vmul.f32 %v1974_v27, %v1969_v32  ;;  %v3008_v26 = vpack.c.bf16 %v2161_v40, %v2160_v19  ;;  %v2180_v27 = vld [vmem:[%s4347_s4 + $0x170] sm:$0xff]  ;;  %v2181_v28 = vld [vmem:[%s4347_s4 + $0x178] sm:$0xff]  ;;  %v2162_v32 = vld [vmem:[%s4347_s4 + $0xe0] sm:$0xff] }
 0x40d   : > { %v2145_v31 = vld [vmem:[%s4347_s4 + $0x58] sm:$0xff] }
 0x40e   : > { %v1982_v38 = vadd.f32 %v1980_v30, %v1976_v63  ;;  %v1981_v46 = vadd.f32 %v1980_v30, %v1975_v36  ;;  %v3050_v30 = vpack.c.bf16 %v2181_v28, %v2180_v27  ;;  %3009 = vmatprep.subr.bf16.mxu0 %v3008_v26  ;;  %v3010_v34 = vpack.c.bf16 %v2145_v31, %v2144_v29  ;;  %v2146_v36 = vld [vmem:[%s4347_s4 + $0x60] sm:$0xff]  ;;  %v2201_v31 = vld [vmem:[%s4347_s4 + $0x218] sm:$0xff] }
 0x40f   : > { %v3012_v63 = vpack.c.bf16 %v2163_v0, %v2162_v32  ;;  %v3014_v42 = vpack.c.bf16 %v2147_v37, %v2146_v36  ;;  %v3053_v29 = vpack.c.bf16 %v2199_v15, %v2198_v14  ;;  %v2203_v36 = vld [vmem:[%s4347_s4 + $0x228] sm:$0xff] }
 0x410   : > { %v1993_v54 = vcombine.high %v1982_v38, %v1982_v38  ;;  %2000 = vst.msk [vmem:[#allocation4 + $0x19] sm:$0xf] %vm1997_vm11, %v1982_v38  ;;  %v1992_v56 = vcombine.high %v1981_v46, %v1981_v46  ;;  %1998 = vst.msk [vmem:[#allocation4 + $0x9] sm:$0xf] %vm1997_vm11, %v1981_v46  ;;  %3051 = vmatpush3.bf16.msra.mxu1 %v3050_v30  ;;  %3011 = vmatpush3.bf16.msra.mxu0 %v3010_v34  ;;  %v3236_v46 = vmov 1983009808  }
 0x411   : > { %3052 = vmatprep.subr.bf16.mxu1 %v3228_v39  ;;  %3013 = vmatprep.subr.bf16.mxu0 %v3012_v63  ;;  %v3018_v38 = vpack.c.bf16 %v2149_v43, %v2148_v5  ;;  %v2089_v16 = vunpack.c.l.s4 %v3236_v46  ;;  %v2200_v30 = vld [vmem:[%s4347_s4 + $0x210] sm:$0xff]  ;;  %v2202_v63 = vld [vmem:[%s4347_s4 + $0x220] sm:$0xff] }
 0x412   : > { %2001 = vst.msk [vmem:[#allocation4 + $0x21] sm:$0xf] %vm1997_vm11, %v1993_v54  ;;  %1999 = vst.msk [vmem:[#allocation4 + $0x11] sm:$0xf] %vm1997_vm11, %v1992_v56  ;;  %v3056_v0 = vpack.c.bf16 %v2201_v31, %v2200_v30  ;;  %v3059_v45 = vpack.c.bf16 %v2203_v36, %v2202_v63 }
 0x413   : > { %v2090_v57 = vunpack.c.0.s8 %v2089_v16 }
 0x414   : > { %3015 = vmatpush3.bf16.msra.mxu0 %v3014_v42 }
 0x415   : > { %3017 = vmatprep.subr.bf16.mxu0 %v3016_v50  ;;  %v2093_v8 = vsub.s32 %v2090_v57, %v3489_v47  ;;  %v2205_v50 = vld [vmem:[%s4347_s4 + $0x238] sm:$0xff] }
 0x417   : > { %v2021_v12 = vld [vmem:[#allocation4 + $0xa] ss:$2 sm:$0x3]  ;;  %v2023_v13 = vld [vmem:[#allocation4 + $0x1a] ss:$2 sm:$0x3] }
 0x418   : > { %2054 = vrot.lane.b32.xlu1 %v2021_v12, %s3233_s16  ;;  %2056 = vrot.lane.b32.xlu0 %v2023_v13, %s3233_s16  ;;  %v2013_v33 = vld [vmem:[#allocation4 + $0x8] ss:$2 sm:$0x3]  ;;  %v2015_v41 = vld [vmem:[#allocation4 + $0x18] ss:$2 sm:$0x3] }
 0x419   : > { %v2029_v17 = vld [vmem:[#allocation4 + $0x11] ss:$2 sm:$0x3]  ;;  %v2031_v18 = vld [vmem:[#allocation4 + $0x21] ss:$2 sm:$0x3]  ;;  %3019 = vmatpush3.bf16.msra.mxu0 %v3018_v38 }
 0x41a   : > { %v2008_v25 = vld [vmem:[#allocation4 + $0x11] ss:$2 sm:$0x3]  ;;  %v2017_v58 = vld [vmem:[#allocation4 + $0x9] ss:$2 sm:$0x3] }
 0x41b   : > { %v2019_v60 = vld [vmem:[#allocation4 + $0x19] ss:$2 sm:$0x3]  ;;  %v2025_v3 = vld [vmem:[#allocation4 + $0x10] ss:$2 sm:$0x3] }
 0x41c   : > { %2062 = vrot.lane.b32.xlu1 %v2029_v17, %s3233_s16  ;;  %2064 = vrot.lane.b32.xlu0 %v2031_v18, %s3233_s16  ;;  %v2027_v52 = vld [vmem:[#allocation4 + $0x20] ss:$2 sm:$0x3]  ;;  %v2004_v17 = vld [vmem:[#allocation4 + $0x10] ss:$2 sm:$0x3] }
 0x41d   : > { %v2002_v12 = vld [vmem:[#allocation4] ss:$2 sm:$0x3]  ;;  %v2033_v48 = vld [vmem:[#allocation4 + $0x12] ss:$2 sm:$0x3] }
 0x41e   : > { %v2010_v13 = vld [vmem:[#allocation4 + $0x2] ss:$2 sm:$0x3]  ;;  %v2109_v5 = vrot.slane %v2033_v48, %v2093_v8 }
 0x420   : > { %2038 = vrot.lane.b32.xlu1 %v2006_v20, %s3233_s16  ;;  %2040 = vrot.lane.b32.xlu0 %v2008_v25, %s3233_s16  ;;  %v2012_v20 = vld [vmem:[#allocation4 + $0x12] ss:$2 sm:$0x3] }
 0x424   : > { %2046 = vrot.lane.b32.xlu1 %v2013_v33, %s3233_s16  ;;  %2048 = vrot.lane.b32.xlu0 %v2015_v41, %s3233_s16  ;;  %v2035_v41 = vld [vmem:[#allocation4 + $0x22] ss:$2 sm:$0x3] }
 0x425   : > { %v2133_v43 = vrot.slane %v2035_v41, %v2093_v8 }
 0x427   : > { %v2228_v46 = vcombine.low %v2109_v5, %v2133_v43 }
 0x429   : > { %v2235_v16 = vrot.slane %v2228_v46, %v2093_v8 }
 0x48a   : > { %v2055_v54 = vpop.permute.xlu1 %2054  ;;  %v2057_v56 = vpop.permute.xlu0 %2056 }
 0x48b   : > { %v2072_v44 = vsel %vm1290_vm10, %v2017_v58, %v2055_v54  ;;  %v2073_v7 = vsel %vm1290_vm10, %v2019_v60, %v2057_v56  ;;  %v2209_v60 = vrot.slane %v4152_v23, %v739_v51  ;;  %v2465_v51 = vld [vmem:[%s4348_s5] sm:$0xf] }
 0x48e   : > { %v2063_v2 = vpop.permute.xlu1 %2062  ;;  %v2065_v1 = vpop.permute.xlu0 %2064 }
 0x48f   : > { %v2074_v62 = vsel %vm1290_vm10, %v2025_v3, %v2063_v2  ;;  %v2075_v6 = vsel %vm1290_vm10, %v2027_v52, %v2065_v1 }
 0x490   : > { %v2087_v59 = vcombine.low %v2072_v44, %v2074_v62  ;;  %v2111_v9 = vcombine.low %v2073_v7, %v2075_v6  ;;  %v2458_v62 = vrot.slane %v4152_v23, %v775_v53 }
 0x492   : > { %v2101_v22 = vrot.slane %v2087_v59, %v2093_v8  ;;  %v2125_v61 = vrot.slane %v2111_v9, %v2093_v8  ;;  %v2039_v10 = vpop.permute.xlu1 %2038  ;;  %v2041_v4 = vpop.permute.xlu0 %2040 }
 0x493   : > { %v2068_v25 = vsel %vm1290_vm10, %v2002_v12, %v2039_v10  ;;  %v2069_v55 = vsel %vm1290_vm10, %v2004_v17, %v2041_v4  ;;  %v3238_v4 = vmov 0  }
 0x494   : > { %v2671_v11 = vcombine.low %v2101_v22, %v2125_v61  ;;  %3212 = vset.pattern.permute.xlu0 %v3238_v4 }
 0x496   : > { %v2047_v18 = vpop.permute.xlu1 %2046  ;;  %v2049_v21 = vpop.permute.xlu0 %2048  ;;  %v2225_v24 = vrot.slane %v2671_v11, %v2093_v8 }
 0x497   : > { %v2070_v19 = vsel %vm1290_vm10, %v2010_v13, %v2047_v18  ;;  %v2071_v40 = vsel %vm1290_vm10, %v2012_v20, %v2049_v21 }
 0x498   : > { %v2086_v26 = vcombine.low %v2068_v25, %v2070_v19  ;;  %v2110_v27 = vcombine.low %v2069_v55, %v2071_v40  ;;  %v2227_v28 = vcombine.high %v2225_v24, %v2225_v24 }
 0x49a   : > { %v2094_v32 = vrot.slane %v2086_v26, %v2093_v8  ;;  %v2118_v33 = vrot.slane %v2110_v27, %v2093_v8  ;;  %2376 = vmatprep.mubr.f32.mxu1 %v2227_v28 }
 0x49b   : > { %2377 = vmatmul.mubr.f32.vlgmr.msra.gmra.mrb[32].mxu1 %v2225_v24 }
 0x49c   : > { %v2670_v34 = vcombine.low %v2094_v32, %v2118_v33  ;;  %3054 = vmatpush3.bf16.msra.mxu1 %v3053_v29  ;;  %2912 = vmatprep.mubr.msk.f32.mxu1 %vm3237_vm12, %v3227_v35  ;;  %v2204_v35 = vld [vmem:[%s4347_s4 + $0x230] sm:$0xff] }
 0x49d   : > { %3055 = vmatprep.subr.bf16.mxu1 %v3228_v39  ;;  %v3062_v38 = vpack.c.bf16 %v2205_v50, %v2204_v35 }
 0x49e   : > { %v2218_v37 = vrot.slane %v2670_v34, %v2093_v8  ;;  %v2463_v8 = vrot.slane %v4152_v23, %v1346_v49 }
 0x4a0   : > { %3057 = vmatpush3.bf16.msra.mxu1 %v3056_v0  ;;  %v2226_v42 = vcombine.high %v2218_v37, %v2218_v37 }
 0x4a1   : > { %3058 = vmatprep.subr.bf16.mxu1 %v3228_v39 }
 0x4a2   : > { %2306 = vmatprep.mubr.f32.mxu0 %v2226_v42 }
 0x4a3   : > { %2307 = vmatmul.mubr.f32.vlgmr.msra.gmra.mrb[22].mxu0 %v2218_v37 }
 0x4a4   : > { %3060 = vmatpush3.bf16.msra.mxu1 %v3059_v45 }
 0x4a5   : > { %3061 = vmatprep.subr.bf16.mxu1 %v3228_v39 }
 0x4a8   : > { %3063 = vmatpush3.bf16.msra.mxu1 %v3062_v38 }
 0x4ab   : > { %2913 = vmatmul.mubr.msk.f32.vlgmr.msra.gmra.mrb[34].mxu1 %vm1290_vm10, %v2235_v16 }
 0x56e   : > { %v2821_v54 = vpop.f32.mrb[32].mxu1 }
 0x56f   : > { %v2822_v56 = vpop.f32.mrb[33].mxu1 }
 0x570   : > { %v2823_v57 = vadd.f32 %v2822_v56, %v2821_v54 }
 0x576   : > { %v2786_v58 = vpop.f32.mrb[22].mxu0 }
 0x577   : > { %v2787_v2 = vpop.f32.mrb[23].mxu0 }
 0x578   : > { %v2788_v3 = vadd.f32 %v2787_v2, %v2786_v58 }
 0x57a   : > { %v2309_v1 = vadd.f32 %v2788_v3, %v2209_v60 }
 0x57c   : > { %v2379_v52 = vadd.f32 %v2823_v57, %v2309_v1 }
 0x57e   : > { %v2448_v44 = vpop.f32.mrb[34].mxu1 }
 0x57f   : > { %v2449_v7 = vadd.f32 %v2448_v44, %v2379_v52  ;;  %v2914_v39 = vpop.f32.mrb[35].mxu1 }
 0x581   : > { %vm2452_vm10 = vcmp.gt.f32.partialorder %v2449_v7, 0.0  ;;  %v2453_v6 = vmul.f32 0.2, %v2449_v7 }
 0x583   : > { %v2454_v59 = vsel %vm2452_vm10, %v2449_v7, %v2453_v6 }
 0x584   : > { %v2459_v9 = vmul.f32 %v2458_v62, %v2454_v59 }
 0x586   : > { %v2464_v22 = vadd.f32 %v2463_v8, %v2459_v9 }
 0x588   : > { %v2466_v61 = vmul.f32 %v2465_v51, %v2464_v22 }
 0x58a   : > { %v2468_v10 = vsel %vm2467_vm13, %v2466_v61, 0.0 }
 0x58b   : > { %2469 = vadd.xlane.f32.xlu1 %v2468_v10 }
 0x618   : > { %v2470_v53 = vpop.xlane.xlu1 %2469 }
 0x619   : > { %v2471_v11 = vsel %vm2467_vm13, %v2470_v53, 0.0 }
 0x61a   : > { %v2472_v12 = vrot.slane %v2471_v11, 4 }
 0x61c   : > { %v2473_v47 = vadd.f32 %v2472_v12, %v2471_v11 }
 0x61e   : > { %v2474_v13 = vrot.slane %v2473_v47, 2 }
 0x620   : > { %v2475_v49 = vadd.f32 %v2474_v13, %v2473_v47 }
 0x622   : > { %v2476_v14 = vrot.slane %v2475_v49, 1 }
 0x624   : > { %v2477_v15 = vadd.f32 %v2476_v14, %v2475_v49 }
 0x626   : > { %v2478_v17 = vadd.f32 %v2477_v15, %v4152_v23 }
 0x628   : > { %v2479_v18 = vsub.f32 0.0, %v2478_v17 }
 0x62a   : > { %v2480_v20 = vmul.f32 1.442695, %v2479_v18 }
 0x62c   : > { %3213 = vpow2.f32 %v2480_v20 }
 0x636   : > { %v3214_v21 = vpop.eup %3213 }
 0x637   : > { %v2482_v24 = vadd.f32 1.0, %v3214_v21 }
 0x639   : > { %3215 = vrcp.f32 %v2482_v24 }
 0x643   : > { %v3216_v25 = vpop.eup %3215 }
 0x644   : > { %2487 = vperm.xlu0 %3212, %v3216_v25  }
 0x6c3   : > { %v2488_v55 = vpop.permute.xlu0 %2487 }
 0x6c4   : > { %2490 = vst [vmem:[%s274_s8 - $0x4] sm:$0x10] %v2488_v55 }
 0x6c5 PF: > { %s17_s24 = sadd.s32 1, %s3224_s24  }
 0x6c6   : > { %p14_p4 = scmp.ge.s32.totalorder %s17_s24, 4  }
 0x6c8   :  { %16 = sbr.rel (!%p14_p4) target bundleno = 1 (0x1), region = 201 }

</bundles_post_ra>
